<compile_context>
chip_gen: v5e
topology: v5e:2x2
jax: 0.10.0
libtpu: 0.0.40
codegen_flags: <defaults>
</compile_context>

<pallas_src>
import jax
import jax.numpy as jnp
from jax.experimental import pallas as pl
from jax.experimental.pallas import tpu as pltpu

BN_EPS = 1e-5                       # PyTorch BatchNorm default eps
VMEM_LIMIT = 32 * 1024 * 1024       # explicit scoped-VMEM limit (safe on v5e/v6e/v7x)
EDGE_TILE_BUDGET = 512 * 1024       # target bytes for one edge tile (double-buffered)


# --------------------------------------------------------------------------------------
# Kernels
# --------------------------------------------------------------------------------------
def _node_matmul_kernel(x_ref, w3_ref, b3_ref, vxe_ref, ux_ref, vxn_ref):
    """Fused node-side matmuls: x @ [Ve | Un | Vn] (block-diagonal over commodities)."""
    _, n, ch = x_ref.shape
    x2 = x_ref[...].reshape(n, ch)
    prod = jnp.dot(x2, w3_ref[...], preferred_element_type=jnp.float32) + b3_ref[...]
    vxe_ref[...] = prod[:, :ch][None]
    ux_ref[...] = prod[:, ch:2 * ch][None]
    vxn_ref[...] = prod[:, 2 * ch:][None]


def _edge_stats_kernel(e_ref, vxe_i_ref, vxe_j_ref, vxn_ref, ux_ref, w_ref, b_ref,
                       xtmp_ref, esum_ref, esq_ref):
    """Pass 1: per-tile e_tmp, streamed gate, node aggregation + one-pass BN partials."""
    _, ti, tj, ch = e_ref.shape
    e2 = e_ref[...].reshape(ti * tj, ch)
    ue = jnp.dot(e2, w_ref[...], preferred_element_type=jnp.float32) + b_ref[...]
    e_tmp = (ue.reshape(ti, tj, ch)
             + vxe_i_ref[0][:, None, :]
             + vxe_j_ref[0][None, :, :])
    gate = jax.nn.sigmoid(e_tmp)
    agg = jnp.sum(gate * vxn_ref[0][None, :, :], axis=1)        # (TI, CH)
    srow = jnp.sum(e_tmp, axis=1)                               # (TI, CH)
    sqrow = jnp.sum(e_tmp * e_tmp, axis=1)                      # (TI, CH)

    @pl.when(pl.program_id(2) == 0)
    def _init():
        xtmp_ref[...] = ux_ref[...]                             # x_tmp starts at Ux
        esum_ref[...] = jnp.zeros_like(esum_ref)
        esq_ref[...] = jnp.zeros_like(esq_ref)

    xtmp_ref[...] += agg[None]
    esum_ref[...] += srow[None]
    esq_ref[...] += sqrow[None]


def _finalize_kernel(e_ref, vxe_i_ref, vxe_j_ref, w_ref, b_ref,
                     esc_ref, esh_ref, xtmp_ref, x_ref, nsc_ref, nsh_ref,
                     e_out_ref, x_out_ref):
    """Pass 2: recompute e_tmp, BN + ReLU + residual for edges (and nodes once per i)."""
    _, ti, tj, ch = e_ref.shape
    e_in = e_ref[...]
    e2 = e_in.reshape(ti * tj, ch)
    ue = jnp.dot(e2, w_ref[...], preferred_element_type=jnp.float32) + b_ref[...]
    e_tmp = (ue.reshape(ti, tj, ch)
             + vxe_i_ref[0][:, None, :]
             + vxe_j_ref[0][None, :, :])
    e_bn = e_tmp * esc_ref[...] + esh_ref[...]
    e_new = jnp.maximum(e_bn, 0.0) + e_in.reshape(ti, tj, ch)
    e_out_ref[...] = e_new[None].astype(e_out_ref.dtype)

    @pl.when(pl.program_id(2) == 0)
    def _node():
        x_bn = xtmp_ref[...] * nsc_ref[...] + nsh_ref[...]
        x_out_ref[...] = (jnp.maximum(x_bn, 0.0) + x_ref[...]).astype(x_out_ref.dtype)


# --------------------------------------------------------------------------------------
# Wrapper
# --------------------------------------------------------------------------------------
def _tile_candidates(n):
    # Prefer tile sizes that keep the second-minor block dim a multiple of 8 (or full N)
    # so DMA tiles line up with the (8, 128) native tiling.
    divs = [d for d in range(1, n + 1) if n % d == 0]
    good = [d for d in divs if d % 8 == 0 or d == n]
    return good if good else divs


def _choose_edge_tiles(n, ch, itemsize=4, budget=EDGE_TILE_BUDGET):
    cands = _tile_candidates(n)
    best = None
    for ti in cands:
        for tj in cands:
            if ti * tj * ch * itemsize <= budget:
                if best is None or ti * tj > best[0] * best[1]:
                    best = (ti, tj)
    if best is None:
        best = (min(cands), min(cands))
    return best


def residual_gated_gcn_layer(x, e, params):
    """params = (wUe, bUe, wVe, bVe, wUn, bUn, wVn, bVn, gamma_e, beta_e, gamma_n, beta_n)
    with weights in PyTorch Linear layout (out, in)."""
    (wUe, bUe, wVe, bVe, wUn, bUn, wVn, bVn, ge, be, gn, bb) = params
    B, N, C, H = x.shape
    assert e.shape == (B, N, N, C, H)
    CH = C * H
    f32 = jnp.float32

    # --- lane-dense folded views (free HBM reshapes) ---
    x_f = x.reshape(B, N, CH)
    e_f = e.reshape(B, N, N, CH)

    # --- block-diagonal (per-commodity) weights, pre-transposed to (in, out) ---
    eye_c = jnp.eye(C, dtype=f32)
    wUe_bd = jnp.kron(eye_c, wUe.T.astype(f32))                              # (CH, CH)
    bUe_t = jnp.tile(bUe.astype(f32), C).reshape(1, CH)
    w3_bd = jnp.concatenate(
        [jnp.kron(eye_c, wVe.T.astype(f32)),
         jnp.kron(eye_c, wUn.T.astype(f32)),
         jnp.kron(eye_c, wVn.T.astype(f32))], axis=1)                        # (CH, 3CH)
    b3_t = jnp.concatenate(
        [jnp.tile(bVe.astype(f32), C),
         jnp.tile(bUn.astype(f32), C),
         jnp.tile(bVn.astype(f32), C)]).reshape(1, 3 * CH)

    cparams1 = pltpu.CompilerParams(dimension_semantics=("parallel",),
                                    vmem_limit_bytes=VMEM_LIMIT)

    # ---------------- pass 0: fused node matmuls (Vxe, Ux, Vxn) ----------------
    node_spec = pl.BlockSpec((1, N, CH), lambda b: (b, 0, 0))
    vxe, ux, vxn = pl.pallas_call(
        _node_matmul_kernel,
        out_shape=(jax.ShapeDtypeStruct((B, N, CH), f32),) * 3,
        grid=(B,),
        in_specs=[node_spec,
                  pl.BlockSpec((CH, 3 * CH), lambda b: (0, 0)),
                  pl.BlockSpec((1, 3 * CH), lambda b: (0, 0))],
        out_specs=(node_spec, node_spec, node_spec),
        compiler_params=cparams1,
    )(x_f, w3_bd, b3_t)

    # ---------------- edge tiling ----------------
    TI, TJ = _choose_edge_tiles(N, CH, itemsize=jnp.dtype(e.dtype).itemsize)
    NI, NJ = N // TI, N // TJ

    e_spec = pl.BlockSpec((1, TI, TJ, CH), lambda b, i, j: (b, i, j, 0))
    row_i_spec = pl.BlockSpec((1, TI, CH), lambda b, i, j: (b, i, 0))
    row_j_spec = pl.BlockSpec((1, TJ, CH), lambda b, i, j: (b, j, 0))
    w_spec = pl.BlockSpec((CH, CH), lambda b, i, j: (0, 0))
    vec_spec = pl.BlockSpec((1, CH), lambda b, i, j: (0, 0))

    cparams3 = pltpu.CompilerParams(
        dimension_semantics=("parallel", "parallel", "arbitrary"),
        vmem_limit_bytes=VMEM_LIMIT)

    # ---------------- pass 1: stats + node aggregation ----------------
    x_tmp, erow_sum, erow_sq = pl.pallas_call(
        _edge_stats_kernel,
        out_shape=(jax.ShapeDtypeStruct((B, N, CH), f32),) * 3,
        grid=(B, NI, NJ),
        in_specs=[e_spec, row_i_spec, row_j_spec, row_j_spec, row_i_spec,
                  w_spec, vec_spec],
        out_specs=(row_i_spec, row_i_spec, row_i_spec),
        compiler_params=cparams3,
    )(e_f, vxe, vxe, vxn, ux, wUe_bd, bUe_t)

    # ---------------- tiny JAX glue: finalize BN statistics ----------------
    cnt_e = B * N * N * C
    sum_e = erow_sum.sum(axis=(0, 1)).reshape(C, H).sum(axis=0)
    sq_e = erow_sq.sum(axis=(0, 1)).reshape(C, H).sum(axis=0)
    mean_e = sum_e / cnt_e
    var_e = jnp.maximum(sq_e / cnt_e - mean_e * mean_e, 0.0)
    scale_e = ge.astype(f32) * jax.lax.rsqrt(var_e + BN_EPS)
    shift_e = be.astype(f32) - mean_e * scale_e
    esc = jnp.tile(scale_e, C).reshape(1, CH)
    esh = jnp.tile(shift_e, C).reshape(1, CH)

    cnt_n = B * N * C
    xr = x_tmp.reshape(B * N * C, H)
    mean_n = xr.sum(axis=0) / cnt_n
    var_n = jnp.maximum((xr * xr).sum(axis=0) / cnt_n - mean_n * mean_n, 0.0)
    scale_n = gn.astype(f32) * jax.lax.rsqrt(var_n + BN_EPS)
    shift_n = bb.astype(f32) - mean_n * scale_n
    nsc = jnp.tile(scale_n, C).reshape(1, CH)
    nsh = jnp.tile(shift_n, C).reshape(1, CH)

    # ---------------- pass 2: normalize + ReLU + residual (e_out aliases e) ----------
    e_out, x_out = pl.pallas_call(
        _finalize_kernel,
        out_shape=(jax.ShapeDtypeStruct((B, N, N, CH), e.dtype),
                   jax.ShapeDtypeStruct((B, N, CH), x.dtype)),
        grid=(B, NI, NJ),
        in_specs=[e_spec, row_i_spec, row_j_spec, w_spec, vec_spec,
                  vec_spec, vec_spec, row_i_spec, row_i_spec, vec_spec, vec_spec],
        out_specs=(e_spec, row_i_spec),
        input_output_aliases={0: 0},                      # e_out reuses e's HBM buffer
        compiler_params=cparams3,
    )(e_f, vxe, vxe, wUe_bd, bUe_t, esc, esh, x_tmp, x_f, nsc, nsh)

    return x_out.reshape(B, N, C, H), e_out.reshape(B, N, N, C, H)


# --------------------------------------------------------------------------------------
# Pure-JAX reference (matches the PyTorch forward in eval mode)
# --------------------------------------------------------------------------------------
def reference(x, e, params):
    wUe, bUe, wVe, bVe, wUn, bUn, wVn, bVn, ge, be, gn, bb = params

    def lin(t, w, b):
        return jnp.dot(t, w.T, preferred_element_type=jnp.float32) + b

    Vxe = lin(x, wVe, bVe)
    e_tmp = lin(e, wUe, bUe) + Vxe[:, :, None] + Vxe[:, None]
    gate = jax.nn.sigmoid(e_tmp)
    x_tmp = lin(x, wUn, bUn) + jnp.sum(gate * lin(x, wVn, bVn)[:, None], axis=2)

    def bn(t, g, b_):
        ax = tuple(range(t.ndim - 1))
        mu = jnp.mean(t, axis=ax, keepdims=True)
        var = jnp.mean((t - mu) ** 2, axis=ax, keepdims=True)
        return (t - mu) * jax.lax.rsqrt(var + BN_EPS) * g + b_

    x_new = jnp.maximum(bn(x_tmp, gn, bb), 0.0) + x
    e_new = jnp.maximum(bn(e_tmp, ge, be), 0.0) + e
    return x_new, e_new


# --------------------------------------------------------------------------------------
if __name__ == "__main__":
    B, N, C, H = 2, 8, 4, 32     # batch, num_nodes, num_commodities, hidden_dim (C*H=128)
    key = jax.random.PRNGKey(0)
    ks = jax.random.split(key, 8)

    x = jax.random.normal(ks[0], (B, N, C, H), jnp.float32)
    e = jax.random.normal(ks[1], (B, N, N, C, H), jnp.float32)

    def make_linear(k):
        kw, kb = jax.random.split(k)
        bound = 1.0 / jnp.sqrt(H)
        w = jax.random.uniform(kw, (H, H), jnp.float32, -bound, bound)
        b = jax.random.uniform(kb, (H,), jnp.float32, -bound, bound)
        return w, b

    wUe, bUe = make_linear(ks[2])
    wVe, bVe = make_linear(ks[3])
    wUn, bUn = make_linear(ks[4])
    wVn, bVn = make_linear(ks[5])
    gamma_e, beta_e = jnp.ones((H,), jnp.float32), jnp.zeros((H,), jnp.float32)
    gamma_n, beta_n = jnp.ones((H,), jnp.float32), jnp.zeros((H,), jnp.float32)
    params = (wUe, bUe, wVe, bVe, wUn, bUn, wVn, bVn,
              gamma_e, beta_e, gamma_n, beta_n)

    # reference first (the kernel aliases e's folded buffer in place)
    x_ref_out, e_ref_out = reference(x, e, params)

    layer = jax.jit(residual_gated_gcn_layer)
    x_new, e_new = layer(x, e, params)
    jax.block_until_ready((x_new, e_new))

    assert x_new.shape == (B, N, C, H) and e_new.shape == (B, N, N, C, H)
    assert jnp.allclose(x_new, x_ref_out, rtol=2e-3, atol=2e-3)
    assert jnp.allclose(e_new, e_ref_out, rtol=2e-3, atol=2e-3)
    print("KERNEL_OK")
</pallas_src>

<mosaic_0001>
module attributes {stable_mosaic.version = 11 : i64} {
  func.func @_node_matmul_kernel(%arg0: i32, %arg1: memref<1x8x128xf32, #tpu.memory_space<vmem>>, %arg2: memref<128x384xf32, #tpu.memory_space<vmem>>, %arg3: memref<1x384xf32, #tpu.memory_space<vmem>>, %arg4: memref<1x8x128xf32, #tpu.memory_space<vmem>>, %arg5: memref<1x8x128xf32, #tpu.memory_space<vmem>>, %arg6: memref<1x8x128xf32, #tpu.memory_space<vmem>>) attributes {dimension_semantics = [#tpu.dimension_semantics<parallel>], iteration_bounds = array<i64: 2>, scalar_prefetch = 0 : i64, scratch_operands = 0 : i64, tpu.core_type = #tpu.core_type<tc>, window_params = [{transform_indices = @transform_0, window_bounds = array<i64: 1, 8, 128>}, {pipeline_mode = #tpu.pipeline_mode<synchronous>, transform_indices = @transform_1, window_bounds = array<i64: 128, 384>}, {pipeline_mode = #tpu.pipeline_mode<synchronous>, transform_indices = @transform_2, window_bounds = array<i64: 1, 384>}, {transform_indices = @transform_3, window_bounds = array<i64: 1, 8, 128>}, {transform_indices = @transform_4, window_bounds = array<i64: 1, 8, 128>}, {transform_indices = @transform_5, window_bounds = array<i64: 1, 8, 128>}]} {
    %c0 = arith.constant 0 : index
    %c0_0 = arith.constant 0 : index
    %c0_1 = arith.constant 0 : index
    %0 = vector.load %arg1[%c0, %c0_0, %c0_1] : memref<1x8x128xf32, #tpu.memory_space<vmem>>, vector<1x8x128xf32>
    %1 = vector.shape_cast %0 : vector<1x8x128xf32> to vector<8x128xf32>
    %c0_2 = arith.constant 0 : index
    %c0_3 = arith.constant 0 : index
    %2 = vector.load %arg2[%c0_2, %c0_3] : memref<128x384xf32, #tpu.memory_space<vmem>>, vector<128x384xf32>
    %cst = arith.constant dense<0.000000e+00> : vector<8x384xf32>
    %3 = tpu.matmul %1, %2, %cst {dimension_numbers = #tpu.dot_dimension_numbers<[1], [0], [0], [1], [0, 0, 1, 1], [], []>} : vector<8x128xf32>, vector<128x384xf32>, vector<8x384xf32> -> vector<8x384xf32>
    %c0_4 = arith.constant 0 : index
    %c0_5 = arith.constant 0 : index
    %4 = vector.load %arg3[%c0_4, %c0_5] : memref<1x384xf32, #tpu.memory_space<vmem>>, vector<1x384xf32>
    %5 = vector.broadcast %4 : vector<1x384xf32> to vector<8x384xf32>
    %6 = arith.addf %3, %5 : vector<8x384xf32>
    %7 = vector.extract_strided_slice %6 {offsets = [0, 0], sizes = [8, 128], strides = [1, 1]} : vector<8x384xf32> to vector<8x128xf32>
    %8 = vector.shape_cast %7 : vector<8x128xf32> to vector<1x8x128xf32>
    %c0_6 = arith.constant 0 : index
    %c0_7 = arith.constant 0 : index
    %c0_8 = arith.constant 0 : index
    %9 = vector.load %arg4[%c0_6, %c0_7, %c0_8] : memref<1x8x128xf32, #tpu.memory_space<vmem>>, vector<1x8x128xf32>
    tpu.vector_store %arg4[%c0_6, %c0_7, %c0_8], %8 {strides = array<i32>} : memref<1x8x128xf32, #tpu.memory_space<vmem>>, vector<1x8x128xf32>,
    %10 = vector.extract_strided_slice %6 {offsets = [0, 128], sizes = [8, 128], strides = [1, 1]} : vector<8x384xf32> to vector<8x128xf32>
    %11 = vector.shape_cast %10 : vector<8x128xf32> to vector<1x8x128xf32>
    %c0_9 = arith.constant 0 : index
    %c0_10 = arith.constant 0 : index
    %c0_11 = arith.constant 0 : index
    %12 = vector.load %arg5[%c0_9, %c0_10, %c0_11] : memref<1x8x128xf32, #tpu.memory_space<vmem>>, vector<1x8x128xf32>
    tpu.vector_store %arg5[%c0_9, %c0_10, %c0_11], %11 {strides = array<i32>} : memref<1x8x128xf32, #tpu.memory_space<vmem>>, vector<1x8x128xf32>,
    %13 = vector.extract_strided_slice %6 {offsets = [0, 256], sizes = [8, 128], strides = [1, 1]} : vector<8x384xf32> to vector<8x128xf32>
    %14 = vector.shape_cast %13 : vector<8x128xf32> to vector<1x8x128xf32>
    %c0_12 = arith.constant 0 : index
    %c0_13 = arith.constant 0 : index
    %c0_14 = arith.constant 0 : index
    %15 = vector.load %arg6[%c0_12, %c0_13, %c0_14] : memref<1x8x128xf32, #tpu.memory_space<vmem>>, vector<1x8x128xf32>
    tpu.vector_store %arg6[%c0_12, %c0_13, %c0_14], %14 {strides = array<i32>} : memref<1x8x128xf32, #tpu.memory_space<vmem>>, vector<1x8x128xf32>,
    return
  }
  func.func @transform_0(%arg0: i32) -> (i32, i32, i32) {
    %c0_i32 = arith.constant 0 : i32
    %c0_i32_0 = arith.constant 0 : i32
    %c0_i32_1 = arith.constant 0 : i32
    return %arg0, %c0_i32, %c0_i32_0 : i32, i32, i32
  }
  func.func @transform_1(%arg0: i32) -> (i32, i32) {
    %c0_i32 = arith.constant 0 : i32
    %c0_i32_0 = arith.constant 0 : i32
    %c0_i32_1 = arith.constant 0 : i32
    return %c0_i32, %c0_i32_0 : i32, i32
  }
  func.func @transform_2(%arg0: i32) -> (i32, i32) {
    %c0_i32 = arith.constant 0 : i32
    %c0_i32_0 = arith.constant 0 : i32
    %c0_i32_1 = arith.constant 0 : i32
    return %c0_i32, %c0_i32_0 : i32, i32
  }
  func.func @transform_3(%arg0: i32) -> (i32, i32, i32) {
    %c0_i32 = arith.constant 0 : i32
    %c0_i32_0 = arith.constant 0 : i32
    %c0_i32_1 = arith.constant 0 : i32
    return %arg0, %c0_i32, %c0_i32_0 : i32, i32, i32
  }
  func.func @transform_4(%arg0: i32) -> (i32, i32, i32) {
    %c0_i32 = arith.constant 0 : i32
    %c0_i32_0 = arith.constant 0 : i32
    %c0_i32_1 = arith.constant 0 : i32
    return %arg0, %c0_i32, %c0_i32_0 : i32, i32, i32
  }
  func.func @transform_5(%arg0: i32) -> (i32, i32, i32) {
    %c0_i32 = arith.constant 0 : i32
    %c0_i32_0 = arith.constant 0 : i32
    %c0_i32_1 = arith.constant 0 : i32
    return %arg0, %c0_i32, %c0_i32_0 : i32, i32, i32
  }
}

module attributes {stable_mosaic.version = 11 : i64} {
  func.func @_edge_stats_kernel(%arg0: i32, %arg1: i32, %arg2: i32, %arg3: memref<1x8x8x128xf32, #tpu.memory_space<vmem>>, %arg4: memref<1x8x128xf32, #tpu.memory_space<vmem>>, %arg5: memref<1x8x128xf32, #tpu.memory_space<vmem>>, %arg6: memref<1x8x128xf32, #tpu.memory_space<vmem>>, %arg7: memref<1x8x128xf32, #tpu.memory_space<vmem>>, %arg8: memref<128x128xf32, #tpu.memory_space<vmem>>, %arg9: memref<1x128xf32, #tpu.memory_space<vmem>>, %arg10: memref<1x8x128xf32, #tpu.memory_space<vmem>>, %arg11: memref<1x8x128xf32, #tpu.memory_space<vmem>>, %arg12: memref<1x8x128xf32, #tpu.memory_space<vmem>>) attributes {dimension_semantics = [#tpu.dimension_semantics<parallel>, #tpu.dimension_semantics<parallel>, #tpu.dimension_semantics<arbitrary>], iteration_bounds = array<i64: 2, 1, 1>, scalar_prefetch = 0 : i64, scratch_operands = 0 : i64, tpu.core_type = #tpu.core_type<tc>, window_params = [{transform_indices = @transform_0, window_bounds = array<i64: 1, 8, 8, 128>}, {transform_indices = @transform_1, window_bounds = array<i64: 1, 8, 128>}, {transform_indices = @transform_2, window_bounds = array<i64: 1, 8, 128>}, {transform_indices = @transform_3, window_bounds = array<i64: 1, 8, 128>}, {transform_indices = @transform_4, window_bounds = array<i64: 1, 8, 128>}, {pipeline_mode = #tpu.pipeline_mode<synchronous>, transform_indices = @transform_5, window_bounds = array<i64: 128, 128>}, {pipeline_mode = #tpu.pipeline_mode<synchronous>, transform_indices = @transform_6, window_bounds = array<i64: 1, 128>}, {transform_indices = @transform_7, window_bounds = array<i64: 1, 8, 128>}, {transform_indices = @transform_8, window_bounds = array<i64: 1, 8, 128>}, {transform_indices = @transform_9, window_bounds = array<i64: 1, 8, 128>}]} {
    %c0 = arith.constant 0 : index
    %c0_0 = arith.constant 0 : index
    %c0_1 = arith.constant 0 : index
    %c0_2 = arith.constant 0 : index
    %0 = vector.load %arg3[%c0, %c0_0, %c0_1, %c0_2] : memref<1x8x8x128xf32, #tpu.memory_space<vmem>>, vector<1x8x8x128xf32>
    %1 = vector.shape_cast %0 : vector<1x8x8x128xf32> to vector<64x128xf32>
    %c0_3 = arith.constant 0 : index
    %c0_4 = arith.constant 0 : index
    %2 = vector.load %arg8[%c0_3, %c0_4] : memref<128x128xf32, #tpu.memory_space<vmem>>, vector<128x128xf32>
    %cst = arith.constant dense<0.000000e+00> : vector<64x128xf32>
    %3 = tpu.matmul %1, %2, %cst {dimension_numbers = #tpu.dot_dimension_numbers<[1], [0], [0], [1], [0, 0, 1, 1], [], []>} : vector<64x128xf32>, vector<128x128xf32>, vector<64x128xf32> -> vector<64x128xf32>
    %c0_5 = arith.constant 0 : index
    %c0_6 = arith.constant 0 : index
    %4 = vector.load %arg9[%c0_5, %c0_6] : memref<1x128xf32, #tpu.memory_space<vmem>>, vector<1x128xf32>
    %5 = vector.broadcast %4 : vector<1x128xf32> to vector<64x128xf32>
    %6 = arith.addf %3, %5 : vector<64x128xf32>
    %7 = vector.shape_cast %6 : vector<64x128xf32> to vector<8x8x128xf32>
    %c0_7 = arith.constant 0 : index
    %c0_8 = arith.constant 0 : index
    %c0_9 = arith.constant 0 : index
    %8 = vector.load %arg4[%c0_7, %c0_8, %c0_9] : memref<1x8x128xf32, #tpu.memory_space<vmem>>, vector<1x8x128xf32>
    %9 = vector.shape_cast %8 : vector<1x8x128xf32> to vector<8x128xf32>
    %10 = vector.shape_cast %9 : vector<8x128xf32> to vector<8x1x128xf32>
    %11 = vector.broadcast %10 : vector<8x1x128xf32> to vector<8x8x128xf32>
    %12 = arith.addf %7, %11 : vector<8x8x128xf32>
    %c0_10 = arith.constant 0 : index
    %c0_11 = arith.constant 0 : index
    %c0_12 = arith.constant 0 : index
    %13 = vector.load %arg5[%c0_10, %c0_11, %c0_12] : memref<1x8x128xf32, #tpu.memory_space<vmem>>, vector<1x8x128xf32>
    %14 = vector.shape_cast %13 : vector<1x8x128xf32> to vector<8x128xf32>
    %15 = vector.shape_cast %14 : vector<8x128xf32> to vector<1x8x128xf32>
    %16 = vector.broadcast %15 : vector<1x8x128xf32> to vector<8x8x128xf32>
    %17 = arith.addf %12, %16 : vector<8x8x128xf32>
    %18 = arith.negf %17 : vector<8x8x128xf32>
    %19 = math.exp %18 : vector<8x8x128xf32>
    %cst_13 = arith.constant 1.000000e+00 : f32
    %20 = vector.broadcast %cst_13 : f32 to vector<8x8x128xf32>
    %21 = arith.addf %20, %19 : vector<8x8x128xf32>
    %22 = arith.divf %20, %21 : vector<8x8x128xf32>
    %c0_14 = arith.constant 0 : index
    %c0_15 = arith.constant 0 : index
    %c0_16 = arith.constant 0 : index
    %23 = vector.load %arg6[%c0_14, %c0_15, %c0_16] : memref<1x8x128xf32, #tpu.memory_space<vmem>>, vector<1x8x128xf32>
    %24 = vector.shape_cast %23 : vector<1x8x128xf32> to vector<8x128xf32>
    %25 = vector.shape_cast %24 : vector<8x128xf32> to vector<1x8x128xf32>
    %26 = vector.broadcast %25 : vector<1x8x128xf32> to vector<8x8x128xf32>
    %27 = arith.mulf %22, %26 : vector<8x8x128xf32>
    %cst_17 = arith.constant dense<0.000000e+00> : vector<8x128xf32>
    %28 = vector.multi_reduction <add>, %27, %cst_17 [1] : vector<8x8x128xf32> to vector<8x128xf32>
    %cst_18 = arith.constant dense<0.000000e+00> : vector<8x128xf32>
    %29 = vector.multi_reduction <add>, %17, %cst_18 [1] : vector<8x8x128xf32> to vector<8x128xf32>
    %30 = arith.mulf %17, %17 : vector<8x8x128xf32>
    %cst_19 = arith.constant dense<0.000000e+00> : vector<8x128xf32>
    %31 = vector.multi_reduction <add>, %30, %cst_19 [1] : vector<8x8x128xf32> to vector<8x128xf32>
    %c0_i32 = arith.constant 0 : i32
    %32 = arith.cmpi eq, %arg2, %c0_i32 : i32
    %33 = arith.extui %32 : i1 to i32
    %c0_i32_20 = arith.constant 0 : i32
    %34 = arith.cmpi ne, %33, %c0_i32_20 : i32
    scf.if %34 {
      %c0_39 = arith.constant 0 : index
      %c0_40 = arith.constant 0 : index
      %c0_41 = arith.constant 0 : index
      %47 = vector.load %arg7[%c0_39, %c0_40, %c0_41] : memref<1x8x128xf32, #tpu.memory_space<vmem>>, vector<1x8x128xf32>
      %c0_42 = arith.constant 0 : index
      %c0_43 = arith.constant 0 : index
      %c0_44 = arith.constant 0 : index
      %48 = vector.load %arg10[%c0_42, %c0_43, %c0_44] : memref<1x8x128xf32, #tpu.memory_space<vmem>>, vector<1x8x128xf32>
      tpu.vector_store %arg10[%c0_42, %c0_43, %c0_44], %47 {strides = array<i32>} : memref<1x8x128xf32, #tpu.memory_space<vmem>>, vector<1x8x128xf32>,
      %cst_45 = arith.constant 0.000000e+00 : f32
      %49 = vector.broadcast %cst_45 : f32 to vector<1x8x128xf32>
      %c0_46 = arith.constant 0 : index
      %c0_47 = arith.constant 0 : index
      %c0_48 = arith.constant 0 : index
      %50 = vector.load %arg11[%c0_46, %c0_47, %c0_48] : memref<1x8x128xf32, #tpu.memory_space<vmem>>, vector<1x8x128xf32>
      tpu.vector_store %arg11[%c0_46, %c0_47, %c0_48], %49 {strides = array<i32>} : memref<1x8x128xf32, #tpu.memory_space<vmem>>, vector<1x8x128xf32>,
      %cst_49 = arith.constant 0.000000e+00 : f32
      %51 = vector.broadcast %cst_49 : f32 to vector<1x8x128xf32>
      %c0_50 = arith.constant 0 : index
      %c0_51 = arith.constant 0 : index
      %c0_52 = arith.constant 0 : index
      %52 = vector.load %arg12[%c0_50, %c0_51, %c0_52] : memref<1x8x128xf32, #tpu.memory_space<vmem>>, vector<1x8x128xf32>
      tpu.vector_store %arg12[%c0_50, %c0_51, %c0_52], %51 {strides = array<i32>} : memref<1x8x128xf32, #tpu.memory_space<vmem>>, vector<1x8x128xf32>,
    } else {
    }
    %c0_21 = arith.constant 0 : index
    %c0_22 = arith.constant 0 : index
    %c0_23 = arith.constant 0 : index
    %35 = vector.load %arg10[%c0_21, %c0_22, %c0_23] : memref<1x8x128xf32, #tpu.memory_space<vmem>>, vector<1x8x128xf32>
    %36 = vector.shape_cast %28 : vector<8x128xf32> to vector<1x8x128xf32>
    %37 = arith.addf %35, %36 : vector<1x8x128xf32>
    %c0_24 = arith.constant 0 : index
    %c0_25 = arith.constant 0 : index
    %c0_26 = arith.constant 0 : index
    %38 = vector.load %arg10[%c0_24, %c0_25, %c0_26] : memref<1x8x128xf32, #tpu.memory_space<vmem>>, vector<1x8x128xf32>
    tpu.vector_store %arg10[%c0_24, %c0_25, %c0_26], %37 {strides = array<i32>} : memref<1x8x128xf32, #tpu.memory_space<vmem>>, vector<1x8x128xf32>,
    %c0_27 = arith.constant 0 : index
    %c0_28 = arith.constant 0 : index
    %c0_29 = arith.constant 0 : index
    %39 = vector.load %arg11[%c0_27, %c0_28, %c0_29] : memref<1x8x128xf32, #tpu.memory_space<vmem>>, vector<1x8x128xf32>
    %40 = vector.shape_cast %29 : vector<8x128xf32> to vector<1x8x128xf32>
    %41 = arith.addf %39, %40 : vector<1x8x128xf32>
    %c0_30 = arith.constant 0 : index
    %c0_31 = arith.constant 0 : index
    %c0_32 = arith.constant 0 : index
    %42 = vector.load %arg11[%c0_30, %c0_31, %c0_32] : memref<1x8x128xf32, #tpu.memory_space<vmem>>, vector<1x8x128xf32>
    tpu.vector_store %arg11[%c0_30, %c0_31, %c0_32], %41 {strides = array<i32>} : memref<1x8x128xf32, #tpu.memory_space<vmem>>, vector<1x8x128xf32>,
    %c0_33 = arith.constant 0 : index
    %c0_34 = arith.constant 0 : index
    %c0_35 = arith.constant 0 : index
    %43 = vector.load %arg12[%c0_33, %c0_34, %c0_35] : memref<1x8x128xf32, #tpu.memory_space<vmem>>, vector<1x8x128xf32>
    %44 = vector.shape_cast %31 : vector<8x128xf32> to vector<1x8x128xf32>
    %45 = arith.addf %43, %44 : vector<1x8x128xf32>
    %c0_36 = arith.constant 0 : index
    %c0_37 = arith.constant 0 : index
    %c0_38 = arith.constant 0 : index
    %46 = vector.load %arg12[%c0_36, %c0_37, %c0_38] : memref<1x8x128xf32, #tpu.memory_space<vmem>>, vector<1x8x128xf32>
    tpu.vector_store %arg12[%c0_36, %c0_37, %c0_38], %45 {strides = array<i32>} : memref<1x8x128xf32, #tpu.memory_space<vmem>>, vector<1x8x128xf32>,
    return
  }
  func.func @transform_0(%arg0: i32, %arg1: i32, %arg2: i32) -> (i32, i32, i32, i32) {
    %c0_i32 = arith.constant 0 : i32
    %c0_i32_0 = arith.constant 0 : i32
    return %arg0, %arg1, %arg2, %c0_i32 : i32, i32, i32, i32
  }
  func.func @transform_1(%arg0: i32, %arg1: i32, %arg2: i32) -> (i32, i32, i32) {
    %c0_i32 = arith.constant 0 : i32
    %c0_i32_0 = arith.constant 0 : i32
    return %arg0, %arg1, %c0_i32 : i32, i32, i32
  }
  func.func @transform_2(%arg0: i32, %arg1: i32, %arg2: i32) -> (i32, i32, i32) {
    %c0_i32 = arith.constant 0 : i32
    %c0_i32_0 = arith.constant 0 : i32
    return %arg0, %arg2, %c0_i32 : i32, i32, i32
  }
  func.func @transform_3(%arg0: i32, %arg1: i32, %arg2: i32) -> (i32, i32, i32) {
    %c0_i32 = arith.constant 0 : i32
    %c0_i32_0 = arith.constant 0 : i32
    return %arg0, %arg2, %c0_i32 : i32, i32, i32
  }
  func.func @transform_4(%arg0: i32, %arg1: i32, %arg2: i32) -> (i32, i32, i32) {
    %c0_i32 = arith.constant 0 : i32
    %c0_i32_0 = arith.constant 0 : i32
    return %arg0, %arg1, %c0_i32 : i32, i32, i32
  }
  func.func @transform_5(%arg0: i32, %arg1: i32, %arg2: i32) -> (i32, i32) {
    %c0_i32 = arith.constant 0 : i32
    %c0_i32_0 = arith.constant 0 : i32
    %c0_i32_1 = arith.constant 0 : i32
    return %c0_i32, %c0_i32_0 : i32, i32
  }
  func.func @transform_6(%arg0: i32, %arg1: i32, %arg2: i32) -> (i32, i32) {
    %c0_i32 = arith.constant 0 : i32
    %c0_i32_0 = arith.constant 0 : i32
    %c0_i32_1 = arith.constant 0 : i32
    return %c0_i32, %c0_i32_0 : i32, i32
  }
  func.func @transform_7(%arg0: i32, %arg1: i32, %arg2: i32) -> (i32, i32, i32) {
    %c0_i32 = arith.constant 0 : i32
    %c0_i32_0 = arith.constant 0 : i32
    return %arg0, %arg1, %c0_i32 : i32, i32, i32
  }
  func.func @transform_8(%arg0: i32, %arg1: i32, %arg2: i32) -> (i32, i32, i32) {
    %c0_i32 = arith.constant 0 : i32
    %c0_i32_0 = arith.constant 0 : i32
    return %arg0, %arg1, %c0_i32 : i32, i32, i32
  }
  func.func @transform_9(%arg0: i32, %arg1: i32, %arg2: i32) -> (i32, i32, i32) {
    %c0_i32 = arith.constant 0 : i32
    %c0_i32_0 = arith.constant 0 : i32
    return %arg0, %arg1, %c0_i32 : i32, i32, i32
  }
}

module attributes {stable_mosaic.version = 11 : i64} {
  func.func @_finalize_kernel(%arg0: i32, %arg1: i32, %arg2: i32, %arg3: memref<1x8x8x128xf32, #tpu.memory_space<vmem>>, %arg4: memref<1x8x128xf32, #tpu.memory_space<vmem>>, %arg5: memref<1x8x128xf32, #tpu.memory_space<vmem>>, %arg6: memref<128x128xf32, #tpu.memory_space<vmem>>, %arg7: memref<1x128xf32, #tpu.memory_space<vmem>>, %arg8: memref<1x128xf32, #tpu.memory_space<vmem>>, %arg9: memref<1x128xf32, #tpu.memory_space<vmem>>, %arg10: memref<1x8x128xf32, #tpu.memory_space<vmem>>, %arg11: memref<1x8x128xf32, #tpu.memory_space<vmem>>, %arg12: memref<1x128xf32, #tpu.memory_space<vmem>>, %arg13: memref<1x128xf32, #tpu.memory_space<vmem>>, %arg14: memref<1x8x8x128xf32, #tpu.memory_space<vmem>>, %arg15: memref<1x8x128xf32, #tpu.memory_space<vmem>>) attributes {dimension_semantics = [#tpu.dimension_semantics<parallel>, #tpu.dimension_semantics<parallel>, #tpu.dimension_semantics<arbitrary>], iteration_bounds = array<i64: 2, 1, 1>, scalar_prefetch = 0 : i64, scratch_operands = 0 : i64, tpu.core_type = #tpu.core_type<tc>, window_params = [{transform_indices = @transform_0, window_bounds = array<i64: 1, 8, 8, 128>}, {transform_indices = @transform_1, window_bounds = array<i64: 1, 8, 128>}, {transform_indices = @transform_2, window_bounds = array<i64: 1, 8, 128>}, {pipeline_mode = #tpu.pipeline_mode<synchronous>, transform_indices = @transform_3, window_bounds = array<i64: 128, 128>}, {pipeline_mode = #tpu.pipeline_mode<synchronous>, transform_indices = @transform_4, window_bounds = array<i64: 1, 128>}, {pipeline_mode = #tpu.pipeline_mode<synchronous>, transform_indices = @transform_5, window_bounds = array<i64: 1, 128>}, {pipeline_mode = #tpu.pipeline_mode<synchronous>, transform_indices = @transform_6, window_bounds = array<i64: 1, 128>}, {transform_indices = @transform_7, window_bounds = array<i64: 1, 8, 128>}, {transform_indices = @transform_8, window_bounds = array<i64: 1, 8, 128>}, {pipeline_mode = #tpu.pipeline_mode<synchronous>, transform_indices = @transform_9, window_bounds = array<i64: 1, 128>}, {pipeline_mode = #tpu.pipeline_mode<synchronous>, transform_indices = @transform_10, window_bounds = array<i64: 1, 128>}, {transform_indices = @transform_11, window_bounds = array<i64: 1, 8, 8, 128>}, {transform_indices = @transform_12, window_bounds = array<i64: 1, 8, 128>}]} {
    %c0 = arith.constant 0 : index
    %c0_0 = arith.constant 0 : index
    %c0_1 = arith.constant 0 : index
    %c0_2 = arith.constant 0 : index
    %0 = vector.load %arg3[%c0, %c0_0, %c0_1, %c0_2] : memref<1x8x8x128xf32, #tpu.memory_space<vmem>>, vector<1x8x8x128xf32>
    %1 = vector.shape_cast %0 : vector<1x8x8x128xf32> to vector<64x128xf32>
    %c0_3 = arith.constant 0 : index
    %c0_4 = arith.constant 0 : index
    %2 = vector.load %arg6[%c0_3, %c0_4] : memref<128x128xf32, #tpu.memory_space<vmem>>, vector<128x128xf32>
    %cst = arith.constant dense<0.000000e+00> : vector<64x128xf32>
    %3 = tpu.matmul %1, %2, %cst {dimension_numbers = #tpu.dot_dimension_numbers<[1], [0], [0], [1], [0, 0, 1, 1], [], []>} : vector<64x128xf32>, vector<128x128xf32>, vector<64x128xf32> -> vector<64x128xf32>
    %c0_5 = arith.constant 0 : index
    %c0_6 = arith.constant 0 : index
    %4 = vector.load %arg7[%c0_5, %c0_6] : memref<1x128xf32, #tpu.memory_space<vmem>>, vector<1x128xf32>
    %5 = vector.broadcast %4 : vector<1x128xf32> to vector<64x128xf32>
    %6 = arith.addf %3, %5 : vector<64x128xf32>
    %7 = vector.shape_cast %6 : vector<64x128xf32> to vector<8x8x128xf32>
    %c0_7 = arith.constant 0 : index
    %c0_8 = arith.constant 0 : index
    %c0_9 = arith.constant 0 : index
    %8 = vector.load %arg4[%c0_7, %c0_8, %c0_9] : memref<1x8x128xf32, #tpu.memory_space<vmem>>, vector<1x8x128xf32>
    %9 = vector.shape_cast %8 : vector<1x8x128xf32> to vector<8x128xf32>
    %10 = vector.shape_cast %9 : vector<8x128xf32> to vector<8x1x128xf32>
    %11 = vector.broadcast %10 : vector<8x1x128xf32> to vector<8x8x128xf32>
    %12 = arith.addf %7, %11 : vector<8x8x128xf32>
    %c0_10 = arith.constant 0 : index
    %c0_11 = arith.constant 0 : index
    %c0_12 = arith.constant 0 : index
    %13 = vector.load %arg5[%c0_10, %c0_11, %c0_12] : memref<1x8x128xf32, #tpu.memory_space<vmem>>, vector<1x8x128xf32>
    %14 = vector.shape_cast %13 : vector<1x8x128xf32> to vector<8x128xf32>
    %15 = vector.shape_cast %14 : vector<8x128xf32> to vector<1x8x128xf32>
    %16 = vector.broadcast %15 : vector<1x8x128xf32> to vector<8x8x128xf32>
    %17 = arith.addf %12, %16 : vector<8x8x128xf32>
    %c0_13 = arith.constant 0 : index
    %c0_14 = arith.constant 0 : index
    %18 = vector.load %arg8[%c0_13, %c0_14] : memref<1x128xf32, #tpu.memory_space<vmem>>, vector<1x128xf32>
    %19 = vector.shape_cast %18 : vector<1x128xf32> to vector<1x1x128xf32>
    %20 = vector.broadcast %19 : vector<1x1x128xf32> to vector<8x8x128xf32>
    %21 = arith.mulf %17, %20 : vector<8x8x128xf32>
    %c0_15 = arith.constant 0 : index
    %c0_16 = arith.constant 0 : index
    %22 = vector.load %arg9[%c0_15, %c0_16] : memref<1x128xf32, #tpu.memory_space<vmem>>, vector<1x128xf32>
    %23 = vector.shape_cast %22 : vector<1x128xf32> to vector<1x1x128xf32>
    %24 = vector.broadcast %23 : vector<1x1x128xf32> to vector<8x8x128xf32>
    %25 = arith.addf %21, %24 : vector<8x8x128xf32>
    %cst_17 = arith.constant 0.000000e+00 : f32
    %26 = vector.broadcast %cst_17 : f32 to vector<8x8x128xf32>
    %27 = arith.maximumf %25, %26 : vector<8x8x128xf32>
    %28 = vector.shape_cast %0 : vector<1x8x8x128xf32> to vector<8x8x128xf32>
    %29 = arith.addf %27, %28 : vector<8x8x128xf32>
    %30 = vector.shape_cast %29 : vector<8x8x128xf32> to vector<1x8x8x128xf32>
    %c0_18 = arith.constant 0 : index
    %c0_19 = arith.constant 0 : index
    %c0_20 = arith.constant 0 : index
    %c0_21 = arith.constant 0 : index
    %31 = vector.load %arg14[%c0_18, %c0_19, %c0_20, %c0_21] : memref<1x8x8x128xf32, #tpu.memory_space<vmem>>, vector<1x8x8x128xf32>
    tpu.vector_store %arg14[%c0_18, %c0_19, %c0_20, %c0_21], %30 {strides = array<i32>} : memref<1x8x8x128xf32, #tpu.memory_space<vmem>>, vector<1x8x8x128xf32>,
    %c0_i32 = arith.constant 0 : i32
    %32 = arith.cmpi eq, %arg2, %c0_i32 : i32
    %33 = arith.extui %32 : i1 to i32
    %c0_i32_22 = arith.constant 0 : i32
    %34 = arith.cmpi ne, %33, %c0_i32_22 : i32
    scf.if %34 {
      %c0_23 = arith.constant 0 : index
      %c0_24 = arith.constant 0 : index
      %c0_25 = arith.constant 0 : index
      %35 = vector.load %arg10[%c0_23, %c0_24, %c0_25] : memref<1x8x128xf32, #tpu.memory_space<vmem>>, vector<1x8x128xf32>
      %c0_26 = arith.constant 0 : index
      %c0_27 = arith.constant 0 : index
      %36 = vector.load %arg12[%c0_26, %c0_27] : memref<1x128xf32, #tpu.memory_space<vmem>>, vector<1x128xf32>
      %37 = vector.shape_cast %36 : vector<1x128xf32> to vector<1x1x128xf32>
      %38 = vector.broadcast %37 : vector<1x1x128xf32> to vector<1x8x128xf32>
      %39 = arith.mulf %35, %38 : vector<1x8x128xf32>
      %c0_28 = arith.constant 0 : index
      %c0_29 = arith.constant 0 : index
      %40 = vector.load %arg13[%c0_28, %c0_29] : memref<1x128xf32, #tpu.memory_space<vmem>>, vector<1x128xf32>
      %41 = vector.shape_cast %40 : vector<1x128xf32> to vector<1x1x128xf32>
      %42 = vector.broadcast %41 : vector<1x1x128xf32> to vector<1x8x128xf32>
      %43 = arith.addf %39, %42 : vector<1x8x128xf32>
      %cst_30 = arith.constant 0.000000e+00 : f32
      %44 = vector.broadcast %cst_30 : f32 to vector<1x8x128xf32>
      %45 = arith.maximumf %43, %44 : vector<1x8x128xf32>
      %c0_31 = arith.constant 0 : index
      %c0_32 = arith.constant 0 : index
      %c0_33 = arith.constant 0 : index
      %46 = vector.load %arg11[%c0_31, %c0_32, %c0_33] : memref<1x8x128xf32, #tpu.memory_space<vmem>>, vector<1x8x128xf32>
      %47 = arith.addf %45, %46 : vector<1x8x128xf32>
      %c0_34 = arith.constant 0 : index
      %c0_35 = arith.constant 0 : index
      %c0_36 = arith.constant 0 : index
      %48 = vector.load %arg15[%c0_34, %c0_35, %c0_36] : memref<1x8x128xf32, #tpu.memory_space<vmem>>, vector<1x8x128xf32>
      tpu.vector_store %arg15[%c0_34, %c0_35, %c0_36], %47 {strides = array<i32>} : memref<1x8x128xf32, #tpu.memory_space<vmem>>, vector<1x8x128xf32>,
    } else {
    }
    return
  }
  func.func @transform_0(%arg0: i32, %arg1: i32, %arg2: i32) -> (i32, i32, i32, i32) {
    %c0_i32 = arith.constant 0 : i32
    %c0_i32_0 = arith.constant 0 : i32
    return %arg0, %arg1, %arg2, %c0_i32 : i32, i32, i32, i32
  }
  func.func @transform_1(%arg0: i32, %arg1: i32, %arg2: i32) -> (i32, i32, i32) {
    %c0_i32 = arith.constant 0 : i32
    %c0_i32_0 = arith.constant 0 : i32
    return %arg0, %arg1, %c0_i32 : i32, i32, i32
  }
  func.func @transform_2(%arg0: i32, %arg1: i32, %arg2: i32) -> (i32, i32, i32) {
    %c0_i32 = arith.constant 0 : i32
    %c0_i32_0 = arith.constant 0 : i32
    return %arg0, %arg2, %c0_i32 : i32, i32, i32
  }
  func.func @transform_3(%arg0: i32, %arg1: i32, %arg2: i32) -> (i32, i32) {
    %c0_i32 = arith.constant 0 : i32
    %c0_i32_0 = arith.constant 0 : i32
    %c0_i32_1 = arith.constant 0 : i32
    return %c0_i32, %c0_i32_0 : i32, i32
  }
  func.func @transform_4(%arg0: i32, %arg1: i32, %arg2: i32) -> (i32, i32) {
    %c0_i32 = arith.constant 0 : i32
    %c0_i32_0 = arith.constant 0 : i32
    %c0_i32_1 = arith.constant 0 : i32
    return %c0_i32, %c0_i32_0 : i32, i32
  }
  func.func @transform_5(%arg0: i32, %arg1: i32, %arg2: i32) -> (i32, i32) {
    %c0_i32 = arith.constant 0 : i32
    %c0_i32_0 = arith.constant 0 : i32
    %c0_i32_1 = arith.constant 0 : i32
    return %c0_i32, %c0_i32_0 : i32, i32
  }
  func.func @transform_6(%arg0: i32, %arg1: i32, %arg2: i32) -> (i32, i32) {
    %c0_i32 = arith.constant 0 : i32
    %c0_i32_0 = arith.constant 0 : i32
    %c0_i32_1 = arith.constant 0 : i32
    return %c0_i32, %c0_i32_0 : i32, i32
  }
  func.func @transform_7(%arg0: i32, %arg1: i32, %arg2: i32) -> (i32, i32, i32) {
    %c0_i32 = arith.constant 0 : i32
    %c0_i32_0 = arith.constant 0 : i32
    return %arg0, %arg1, %c0_i32 : i32, i32, i32
  }
  func.func @transform_8(%arg0: i32, %arg1: i32, %arg2: i32) -> (i32, i32, i32) {
    %c0_i32 = arith.constant 0 : i32
    %c0_i32_0 = arith.constant 0 : i32
    return %arg0, %arg1, %c0_i32 : i32, i32, i32
  }
  func.func @transform_9(%arg0: i32, %arg1: i32, %arg2: i32) -> (i32, i32) {
    %c0_i32 = arith.constant 0 : i32
    %c0_i32_0 = arith.constant 0 : i32
    %c0_i32_1 = arith.constant 0 : i32
    return %c0_i32, %c0_i32_0 : i32, i32
  }
  func.func @transform_10(%arg0: i32, %arg1: i32, %arg2: i32) -> (i32, i32) {
    %c0_i32 = arith.constant 0 : i32
    %c0_i32_0 = arith.constant 0 : i32
    %c0_i32_1 = arith.constant 0 : i32
    return %c0_i32, %c0_i32_0 : i32, i32
  }
  func.func @transform_11(%arg0: i32, %arg1: i32, %arg2: i32) -> (i32, i32, i32, i32) {
    %c0_i32 = arith.constant 0 : i32
    %c0_i32_0 = arith.constant 0 : i32
    return %arg0, %arg1, %arg2, %c0_i32 : i32, i32, i32, i32
  }
  func.func @transform_12(%arg0: i32, %arg1: i32, %arg2: i32) -> (i32, i32, i32) {
    %c0_i32 = arith.constant 0 : i32
    %c0_i32_0 = arith.constant 0 : i32
    return %arg0, %arg1, %c0_i32 : i32, i32, i32
  }
}

</mosaic_0001>

<bundles_post_ra>
// kernel: tile.48
= control target key start
LH: loop header
LB: loop body
LE: loop exit
PB: predicated region body
PF: predicated region fallthrough
CT: control target
= control target key end

     0   :  { %s22_s0 = inlined_call_operand.vmem [shape: f32[32], index: 0, kind: input, shape index: {}]   ;;  %s23_s1 = inlined_call_operand.vmem [shape: f32[4,32], index: 1, kind: output, shape index: {}]  }
   0x1   :  { %v4_v0 = vld [vmem:[%s22_s0] ss:$0 sm:$0xff] }
   0x2   :  { %5 = vst [vmem:[%s23_s1] sm:$0xf] %v4_v0 }

// kernel: tile.49
= control target key start
LH: loop header
LB: loop body
LE: loop exit
PB: predicated region body
PF: predicated region fallthrough
CT: control target
= control target key end

     0   :  { %s37_s8 = smov 32   ;;  %s38_s9 = smov 64   ;;  %vm7_vm0 = vcmask 261120   ;;  %vm13_vm1 = vcmask 1048320   ;;  %vm19_vm2 = vcmask 785920   ;;  %vm25_vm3 = vcmask 523520   ;;  %s55_s0 = inlined_call_operand.vmem [shape: f32[4,32], index: 0, kind: input, shape index: {}]   ;;  %s56_s1 = inlined_call_operand.vmem [shape: f32[128], index: 1, kind: output, shape index: {}]  }
   0x1   :  { %v4_v0 = vld [vmem:[%s55_s0] sm:$0xf]  ;;  %s36_s0 = smov 96  }
   0x2   :  { %5 = vst [vmem:[#allocation1] sm:$0xf] %v4_v0 }
   0x9   :  { %v10_v1 = vld [vmem:[#allocation1 + $0x3] sm:$0x1]   ;;  %v22_v2 = vld [vmem:[#allocation1 + $0x1] sm:$0x1]   ;;  %v16_v3 = vld [vmem:[#allocation1 + $0x2] sm:$0x1]  }
   0xa   :  { %11 = vrot.lane.b32.xlu0 %v10_v1, %s36_s0  ;;  %23 = vrot.lane.b32.xlu1 %v22_v2, %s37_s8  ;;  %v6_v4 = vld [vmem:[#allocation1] sm:$0x1]  }
   0xb   :  { %8 = vst.msk [vmem:[#allocation0] sm:$0x1] %vm7_vm0, %v6_v4  }
  0x12   :  { %17 = vrot.lane.b32.xlu0 %v16_v3, %s38_s9 }
  0x7c   :  { %v12_v5 = vpop.permute.xlu0 %11   ;;  %v24_v6 = vpop.permute.xlu1 %23  }
  0x7d   :  { %14 = vst.msk [vmem:[#allocation0] sm:$0x1] %vm13_vm1, %v12_v5  }
  0x84   :  { %v18_v7 = vpop.permute.xlu0 %17  }
  0x85   :  { %20 = vst.msk [vmem:[#allocation0] sm:$0x1] %vm19_vm2, %v18_v7  }
  0x86   :  { %26 = vst.msk [vmem:[#allocation0] sm:$0x1] %vm25_vm3, %v24_v6  }
  0x8d   :  { %v29_v8 = vld [vmem:[#allocation0] sm:$0x1] }
  0x8e   :  { %32 = vst [vmem:[%s56_s1] sm:$0x1] %v29_v8 }

// kernel: tile.44
= control target key start
LH: loop header
LB: loop body
LE: loop exit
PB: predicated region body
PF: predicated region fallthrough
CT: control target
= control target key end

     0   :  { %s37_s8 = smov 32   ;;  %s38_s9 = smov 64   ;;  %vm7_vm0 = vcmask 261120   ;;  %vm13_vm1 = vcmask 1048320   ;;  %vm19_vm2 = vcmask 785920   ;;  %vm25_vm3 = vcmask 523520   ;;  %s55_s0 = inlined_call_operand.vmem [shape: f32[4,32], index: 0, kind: input, shape index: {}]   ;;  %s56_s1 = inlined_call_operand.vmem [shape: f32[1,128], index: 1, kind: output, shape index: {}]  }
   0x1   :  { %v4_v0 = vld [vmem:[%s55_s0] sm:$0xf]  ;;  %s36_s0 = smov 96  }
   0x2   :  { %5 = vst [vmem:[#allocation1] sm:$0xf] %v4_v0 }
   0x9   :  { %v10_v1 = vld [vmem:[#allocation1 + $0x3] sm:$0x1]   ;;  %v22_v2 = vld [vmem:[#allocation1 + $0x1] sm:$0x1]   ;;  %v16_v3 = vld [vmem:[#allocation1 + $0x2] sm:$0x1]  }
   0xa   :  { %11 = vrot.lane.b32.xlu0 %v10_v1, %s36_s0  ;;  %23 = vrot.lane.b32.xlu1 %v22_v2, %s37_s8  ;;  %v6_v4 = vld [vmem:[#allocation1] sm:$0x1]  }
   0xb   :  { %8 = vst.msk [vmem:[#allocation0] sm:$0x1] %vm7_vm0, %v6_v4  }
  0x12   :  { %17 = vrot.lane.b32.xlu0 %v16_v3, %s38_s9 }
  0x7c   :  { %v12_v5 = vpop.permute.xlu0 %11   ;;  %v24_v6 = vpop.permute.xlu1 %23  }
  0x7d   :  { %14 = vst.msk [vmem:[#allocation0] sm:$0x1] %vm13_vm1, %v12_v5  }
  0x84   :  { %v18_v7 = vpop.permute.xlu0 %17  }
  0x85   :  { %20 = vst.msk [vmem:[#allocation0] sm:$0x1] %vm19_vm2, %v18_v7  }
  0x86   :  { %26 = vst.msk [vmem:[#allocation0] sm:$0x1] %vm25_vm3, %v24_v6  }
  0x8d   :  { %v29_v8 = vld [vmem:[#allocation0] sm:$0x1] }
  0x8e   :  { %32 = vst [vmem:[%s56_s1] sm:$0x1] %v29_v8 }

// kernel: residual_gated_gcn_layer.3
= control target key start
LH: loop header
LB: loop body
LE: loop exit
PB: predicated region body
PF: predicated region fallthrough
CT: control target
= control target key end

     0   :  { %s533_s18 = smov 0   ;;  %s713_s0 = inlined_call_operand.vmem [shape: f32[2,8,128], index: 0, kind: input, shape index: {}]   ;;  %s714_s1 = inlined_call_operand.vmem [shape: f32[128,384], index: 1, kind: input, shape index: {}]   ;;  %s715_s2 = inlined_call_operand.vmem [shape: f32[1,384], index: 2, kind: input, shape index: {}]   ;;  %s716_s3 = inlined_call_operand.vmem [shape: f32[2,8,128], index: 3, kind: output, shape index: {0}]   ;;  %s717_s4 = inlined_call_operand.vmem [shape: f32[2,8,128], index: 4, kind: output, shape index: {1}]   ;;  %s718_s5 = inlined_call_operand.vmem [shape: f32[2,8,128], index: 5, kind: output, shape index: {2}]  }
   0x1 LB: > { %s476_s19 = sadd.s32 4294967295, %s501_s18   ;;  %p480_p0 = scmp.ge.s32.totalorder %s501_s18, 1  ;;  %s501_s18 = sphi %s533_s18, %s16_s18  }
   0x2   : > { %p191_p1 = scmp.lt.s32.totalorder %s501_s18, 3 }
   0x4   : > { %p192_p2 = pnand %p480_p0, %p191_p1 }
   0x5   : > { %p225_p3 = scmp.lt.s32.totalorder (!%p192_p2), %s476_s19, 1 }
   0x6   : > { %195 = sbr.rel (%p192_p2) target bundleno = 178 (0xb2), region = 32 }
   0xb   : > { %v289_v0 = vld [vmem:[%s714_s1 + $0x178] sm:$0xff]  ;;  %v286_v1 = vld [vmem:[%s714_s1 + $0x160] sm:$0xff]  ;;  %v287_v2 = vld [vmem:[%s714_s1 + $0x168] sm:$0xff]  ;;  %s720_s19 = smov (!%p225_p3, %s476_s19), 1 }
   0xc   : > { %338 = vmatpush.msra.mxu2 %v289_v0  ;;  %v288_v3 = vld [vmem:[%s714_s1 + $0x170] sm:$0xff]  ;;  %v283_v4 = vld [vmem:[%s714_s1 + $0x148] sm:$0xff]  ;;  %298 = vmatpush.msra.mxu0 %v287_v2  ;;  %v285_v6 = vld [vmem:[%s714_s1 + $0x158] sm:$0xff]  ;;  %s662_s29 = sshll.u32 %s720_s19, 3 }
   0xd   : > { %318 = vmatpush.msra.mxu1 %v288_v3  ;;  %v284_v5 = vld [vmem:[%s714_s1 + $0x150] sm:$0xff]  ;;  %v281_v7 = vld [vmem:[%s714_s1 + $0x138] sm:$0xff]  ;;  %v282_v8 = vld [vmem:[%s714_s1 + $0x140] sm:$0xff]  ;;  %s228_s14 = scalar_lea.vmem %s713_s0, %s662_s29  ;;  %s232_s7 = scalar_lea.vmem %s716_s3, %s662_s29 }
   0xe   : > { %339 = vmatpush.msra.mxu2 %v286_v1  ;;  %v280_v9 = vld [vmem:[%s714_s1 + $0x130] sm:$0xff]  ;;  %299 = vmatpush.msra.mxu0 %v284_v5  ;;  %v278_v10 = vld [vmem:[%s714_s1 + $0x120] sm:$0xff]  ;;  %v279_v11 = vld [vmem:[%s714_s1 + $0x128] sm:$0xff]  ;;  %s236_s10 = scalar_lea.vmem %s717_s4, %s662_s29  ;;  %s240_s19 = scalar_lea.vmem %s718_s5, %s662_s29 }
   0xf   : > { %319 = vmatpush.msra.mxu1 %v285_v6  ;;  %v277_v12 = vld [vmem:[%s714_s1 + $0x118] sm:$0xff]  ;;  %v275_v13 = vld [vmem:[%s714_s1 + $0x108] sm:$0xff]  ;;  %v276_v14 = vld [vmem:[%s714_s1 + $0x110] sm:$0xff] }
  0x10   : > { %340 = vmatpush.msra.mxu2 %v283_v4  ;;  %300 = vmatpush.msra.mxu0 %v281_v7  ;;  %v274_v15 = vld [vmem:[%s714_s1 + $0x100] sm:$0xff]  ;;  %v272_v16 = vld [vmem:[%s714_s1 + $0xf0] sm:$0xff]  ;;  %v273_v17 = vld [vmem:[%s714_s1 + $0xf8] sm:$0xff] }
  0x11   : > { %320 = vmatpush.msra.mxu1 %v282_v8  ;;  %v271_v18 = vld [vmem:[%s714_s1 + $0xe8] sm:$0xff]  ;;  %v269_v19 = vld [vmem:[%s714_s1 + $0xd8] sm:$0xff]  ;;  %v270_v20 = vld [vmem:[%s714_s1 + $0xe0] sm:$0xff] }
  0x12   : > { %341 = vmatpush.msra.mxu2 %v280_v9  ;;  %301 = vmatpush.msra.mxu0 %v278_v10  ;;  %v268_v21 = vld [vmem:[%s714_s1 + $0xd0] sm:$0xff]  ;;  %v266_v22 = vld [vmem:[%s714_s1 + $0xc0] sm:$0xff]  ;;  %v267_v23 = vld [vmem:[%s714_s1 + $0xc8] sm:$0xff] }
  0x13   : > { %321 = vmatpush.msra.mxu1 %v279_v11  ;;  %v265_v24 = vld [vmem:[%s714_s1 + $0xb8] sm:$0xff]  ;;  %v263_v25 = vld [vmem:[%s714_s1 + $0xa8] sm:$0xff]  ;;  %v264_v26 = vld [vmem:[%s714_s1 + $0xb0] sm:$0xff] }
  0x14   : > { %342 = vmatpush.msra.mxu2 %v277_v12  ;;  %302 = vmatpush.msra.mxu0 %v275_v13  ;;  %v262_v27 = vld [vmem:[%s714_s1 + $0xa0] sm:$0xff]  ;;  %v260_v28 = vld [vmem:[%s714_s1 + $0x90] sm:$0xff]  ;;  %v261_v29 = vld [vmem:[%s714_s1 + $0x98] sm:$0xff] }
  0x15   : > { %322 = vmatpush.msra.mxu1 %v276_v14  ;;  %v259_v30 = vld [vmem:[%s714_s1 + $0x88] sm:$0xff]  ;;  %v257_v31 = vld [vmem:[%s714_s1 + $0x78] sm:$0xff]  ;;  %v258_v32 = vld [vmem:[%s714_s1 + $0x80] sm:$0xff] }
  0x16   : > { %343 = vmatpush.msra.mxu2 %v274_v15  ;;  %303 = vmatpush.msra.mxu0 %v272_v16  ;;  %v256_v33 = vld [vmem:[%s714_s1 + $0x70] sm:$0xff]  ;;  %v254_v34 = vld [vmem:[%s714_s1 + $0x60] sm:$0xff]  ;;  %v255_v35 = vld [vmem:[%s714_s1 + $0x68] sm:$0xff] }
  0x17   : > { %323 = vmatpush.msra.mxu1 %v273_v17  ;;  %v253_v36 = vld [vmem:[%s714_s1 + $0x58] sm:$0xff]  ;;  %v251_v37 = vld [vmem:[%s714_s1 + $0x48] sm:$0xff]  ;;  %v252_v38 = vld [vmem:[%s714_s1 + $0x50] sm:$0xff] }
  0x18   : > { %344 = vmatpush.msra.mxu2 %v271_v18  ;;  %304 = vmatpush.msra.mxu0 %v269_v19  ;;  %v250_v39 = vld [vmem:[%s714_s1 + $0x40] sm:$0xff]  ;;  %v248_v40 = vld [vmem:[%s714_s1 + $0x30] sm:$0xff]  ;;  %v249_v41 = vld [vmem:[%s714_s1 + $0x38] sm:$0xff] }
  0x19   : > { %324 = vmatpush.msra.mxu1 %v270_v20  ;;  %v247_v42 = vld [vmem:[%s714_s1 + $0x28] sm:$0xff]  ;;  %v245_v43 = vld [vmem:[%s714_s1 + $0x18] sm:$0xff]  ;;  %v246_v44 = vld [vmem:[%s714_s1 + $0x20] sm:$0xff] }
  0x1a   : > { %345 = vmatpush.msra.mxu2 %v268_v21  ;;  %305 = vmatpush.msra.mxu0 %v266_v22  ;;  %v244_v45 = vld [vmem:[%s714_s1 + $0x10] sm:$0xff]  ;;  %v241_v46 = vld [vmem:[%s228_s14] sm:$0xff]  ;;  %v243_v48 = vld [vmem:[%s714_s1 + $0x8] sm:$0xff] }
  0x1b   : > { %325 = vmatpush.msra.mxu1 %v267_v23  ;;  %v242_v47 = vld [vmem:[%s714_s1] sm:$0xff] }
  0x1c   : > { %346 = vmatpush.msra.mxu2 %v265_v24  ;;  %306 = vmatpush.msra.mxu0 %v263_v25  ;;  %v290_v49 = vld [vmem:[%s715_s2] sm:$0x7] }
  0x1d   : > { %326 = vmatpush.msra.mxu1 %v264_v26  ;;  %v292_v50 = vperm.slane %v290_v49, 0  ;;  %v293_v51 = vperm.slane %v290_v49, 1  ;;  %v294_v56 = vperm.slane %v290_v49, 2 }
  0x1e   : > { %347 = vmatpush.msra.mxu2 %v262_v27  ;;  %307 = vmatpush.msra.mxu0 %v260_v28 }
  0x1f   : > { %327 = vmatpush.msra.mxu1 %v261_v29 }
  0x20   : > { %348 = vmatpush.msra.mxu2 %v259_v30  ;;  %308 = vmatpush.msra.mxu0 %v257_v31 }
  0x21   : > { %328 = vmatpush.msra.mxu1 %v258_v32 }
  0x22   : > { %349 = vmatpush.msra.mxu2 %v256_v33  ;;  %309 = vmatpush.msra.mxu0 %v254_v34 }
  0x23   : > { %329 = vmatpush.msra.mxu1 %v255_v35 }
  0x24   : > { %350 = vmatpush.msra.mxu2 %v253_v36  ;;  %310 = vmatpush.msra.mxu0 %v251_v37 }
  0x25   : > { %330 = vmatpush.msra.mxu1 %v252_v38 }
  0x26   : > { %351 = vmatpush.msra.mxu2 %v250_v39  ;;  %311 = vmatpush.msra.mxu0 %v248_v40 }
  0x27   : > { %331 = vmatpush.msra.mxu1 %v249_v41 }
  0x28   : > { %352 = vmatpush.msra.mxu2 %v247_v42  ;;  %312 = vmatpush.msra.mxu0 %v245_v43 }
  0x29   : > { %332 = vmatpush.msra.mxu1 %v246_v44 }
  0x2a   : > { %353 = vmatpush.msra.mxu2 %v244_v45  ;;  %313 = vmatpush.msra.mxu0 %v242_v47 }
  0x2b   : > { %354 = vmatmul.f32.vlgmr.msra.gmra.mxu2 %v241_v46  ;;  %333 = vmatpush.msra.mxu1 %v243_v48 }
  0x2c   : > { %314 = vmatmul.f32.vlgmr.msra.gmra.mxu0 %v241_v46  ;;  %334 = vmatmul.f32.vlgmr.msra.gmra.mxu1 %v241_v46 }
  0xa9   : > { %v315_v52 = vpop.f32.mrf.mxu0  ;;  %v335_v54 = vpop.f32.mrf.mxu1 }
  0xaa   : > { %v316_v53 = vadd.f32 %v315_v52, %v292_v50  ;;  %v336_v55 = vadd.f32 %v335_v54, %v293_v51 }
  0xac   : > { %358 = vst [vmem:[%s232_s7] sm:$0xff] %v316_v53 }
  0xad   : > { %359 = vst [vmem:[%s236_s10] sm:$0xff] %v336_v55 }
  0xae   : > { %v355_v57 = vpop.f32.mrf.mxu2 }
  0xaf   : > { %v356_v58 = vadd.f32 %v355_v57, %v294_v56 }
  0xb1   : > { %360 = vst [vmem:[%s240_s19] sm:$0xff] %v356_v58 }
  0xb2 PF: > { %s16_s18 = sadd.s32 1, %s501_s18  }
  0xb3   : > { %p13_p4 = scmp.ge.s32.totalorder %s16_s18, 4  }
  0xb5   :  { %15 = sbr.rel (!%p13_p4) target bundleno = 1 (0x1), region = 86 }

// kernel: residual_gated_gcn_layer.5
= control target key start
LH: loop header
LB: loop body
LE: loop exit
PB: predicated region body
PF: predicated region fallthrough
CT: control target
= control target key end

     0   :  { %s1176_s21 = smov 0   ;;  %s1178_s22 = smov 0   ;;  %s1361_s0 = inlined_call_operand.vmem [shape: f32[2,8,8,128], index: 0, kind: input, shape index: {}, may-alias: {0,11}]   ;;  %s1362_s1 = inlined_call_operand.vmem [shape: f32[2,8,128], index: 1, kind: input, shape index: {}, may-alias: {1,2}]   ;;  %s1363_s2 = inlined_call_operand.vmem [shape: f32[2,8,128], index: 2, kind: input, shape index: {}, may-alias: {1,2}]   ;;  %s1364_s3 = inlined_call_operand.vmem [shape: f32[128,128], index: 3, kind: input, shape index: {}]   ;;  %s1365_s4 = inlined_call_operand.vmem [shape: f32[1,128], index: 4, kind: input, shape index: {}]   ;;  %s1366_s5 = inlined_call_operand.vmem [shape: f32[1,128], index: 5, kind: input, shape index: {}]   ;;  %s1367_s6 = inlined_call_operand.vmem [shape: f32[1,128], index: 6, kind: input, shape index: {}]   ;;  %s1368_s7 = inlined_call_operand.vmem [shape: f32[2,8,128], index: 7, kind: input, shape index: {}]   ;;  %s1369_s8 = inlined_call_operand.vmem [shape: f32[2,8,128], index: 8, kind: input, shape index: {}]   ;;  %s1370_s9 = inlined_call_operand.vmem [shape: f32[1,128], index: 9, kind: input, shape index: {}]   ;;  %s1371_s10 = inlined_call_operand.vmem [shape: f32[1,128], index: 10, kind: input, shape index: {}]   ;;  %s1372_s11 = inlined_call_operand.vmem [shape: f32[2,8,8,128], index: 11, kind: output, shape index: {0}, may-alias: {0,11}]   ;;  %s1373_s12 = inlined_call_operand.vmem [shape: f32[2,8,128], index: 12, kind: output, shape index: {1}]  }
   0x1   :  { %s1180_s23 = smov 0  }
   0x2 LB: > { %s42_s24 = sadd.s32 1, %s1105_s22  ;;  %p996_p0 = scmp.ge.s32.totalorder %s1109_s23, 1  ;;  %s1109_s23 = sphi %s1180_s23, %s23_s23   ;;  %s1105_s22 = sphi %s1178_s22, %s1375_s22   ;;  %s1101_s21 = sphi %s1176_s21, %s1374_s21  }
   0x3   : > { %p44_p1 = scmp.ge.s32.totalorder %s42_s24, 2  ;;  %p458_p2 = scmp.lt.s32.totalorder %s1109_s23, 3 }
   0x5   : > { %s1377_s24 = smov (%p44_p1, %s42_s24), 0  ;;  %p459_p3 = pnand %p996_p0, %p458_p2 }
   0x6   : > { %p550_p4 = scmp.lt.s32.totalorder (!%p459_p3), %s1101_s21, 1 }
   0x7   : > { %462 = sbr.rel (%p459_p3) target bundleno = 201 (0xc9), region = 64 }
   0xc   : > { %v633_v0 = vld [vmem:[%s1364_s3 + $0x78] sm:$0xff]  ;;  %v632_v1 = vld [vmem:[%s1364_s3 + $0x70] sm:$0xff]  ;;  %v631_v2 = vld [vmem:[%s1364_s3 + $0x68] sm:$0xff]  ;;  %s1379_s21 = smov (!%p550_p4, %s1101_s21), 1 }
   0xd   : > { %1011 = vmatpush.msra.mxu2 %v633_v0  ;;  %1012 = vmatpush.msra.mxu3 %v633_v0  ;;  %v630_v3 = vld [vmem:[%s1364_s3 + $0x60] sm:$0xff]  ;;  %v629_v4 = vld [vmem:[%s1364_s3 + $0x58] sm:$0xff]  ;;  %v628_v5 = vld [vmem:[%s1364_s3 + $0x50] sm:$0xff]  ;;  %s1008_s19 = sshll.u32 %s1379_s21, 6  ;;  %s999_s15 = sshll.u32 %s1379_s21, 3 }
   0xe   : > { %638 = vmatpush.msra.mxu0 %v633_v0  ;;  %1010 = vmatpush.msra.mxu1 %v633_v0  ;;  %v627_v6 = vld [vmem:[%s1364_s3 + $0x48] sm:$0xff]  ;;  %v626_v7 = vld [vmem:[%s1364_s3 + $0x40] sm:$0xff]  ;;  %v625_v8 = vld [vmem:[%s1364_s3 + $0x38] sm:$0xff]  ;;  %s560_s30 = scalar_lea.vmem %s1361_s0, %s1008_s19  ;;  %s582_s18 = scalar_lea.vmem %s1368_s7, %s999_s15 }
   0xf   : > { %1014 = vmatpush.msra.mxu2 %v632_v1  ;;  %1015 = vmatpush.msra.mxu3 %v632_v1  ;;  %v624_v9 = vld [vmem:[%s1364_s3 + $0x30] sm:$0xff]  ;;  %v623_v10 = vld [vmem:[%s1364_s3 + $0x28] sm:$0xff]  ;;  %v622_v11 = vld [vmem:[%s1364_s3 + $0x20] sm:$0xff]  ;;  %s568_s16 = scalar_lea.vmem %s1362_s1, %s999_s15  ;;  %s609_s20 = scalar_lea.vmem %s1373_s12, %s999_s15 }
  0x10   : > { %639 = vmatpush.msra.mxu0 %v632_v1  ;;  %1013 = vmatpush.msra.mxu1 %v632_v1  ;;  %v621_v12 = vld [vmem:[%s1364_s3 + $0x18] sm:$0xff]  ;;  %v620_v13 = vld [vmem:[%s1364_s3 + $0x10] sm:$0xff]  ;;  %v619_v14 = vld [vmem:[%s1364_s3 + $0x8] sm:$0xff]  ;;  %s575_s29 = scalar_lea.vmem %s1363_s2, %s999_s15 }
  0x11   : > { %1017 = vmatpush.msra.mxu2 %v631_v2  ;;  %1018 = vmatpush.msra.mxu3 %v631_v2  ;;  %v618_v15 = vld [vmem:[%s1364_s3] sm:$0xff]  ;;  %v1256_v17 = vld [vmem:[%s560_s30 + $0x30] sm:$0xff]  ;;  %v1266_v20 = vld [vmem:[%s560_s30 + $0x28] sm:$0xff] }
  0x12   : > { %640 = vmatpush.msra.mxu0 %v631_v2  ;;  %1016 = vmatpush.msra.mxu1 %v631_v2  ;;  %v1254_v16 = vld [vmem:[%s560_s30 + $0x20] sm:$0xff]  ;;  %v1260_v19 = vld [vmem:[%s560_s30 + $0x10] sm:$0xff]  ;;  %v1268_v21 = vld [vmem:[%s560_s30 + $0x38] sm:$0xff] }
  0x13   : > { %1020 = vmatpush.msra.mxu2 %v630_v3  ;;  %1021 = vmatpush.msra.mxu3 %v630_v3  ;;  %v1258_v18 = vld [vmem:[%s560_s30] sm:$0xff]  ;;  %v1270_v22 = vld [vmem:[%s560_s30 + $0x8] sm:$0xff]  ;;  %v1272_v23 = vld [vmem:[%s560_s30 + $0x18] sm:$0xff]  ;;  %s589_s30 = scalar_lea.vmem %s1369_s8, %s999_s15 }
  0x14   : > { %641 = vmatpush.msra.mxu0 %v630_v3  ;;  %1019 = vmatpush.msra.mxu1 %v630_v3  ;;  %v773_v24 = vld [vmem:[%s582_s18] sm:$0xff]  ;;  %s1326_s18 = scalar_lea.vmem %s1372_s11, %s1008_s19 }
  0x15   : > { %1023 = vmatpush.msra.mxu2 %v629_v4  ;;  %1024 = vmatpush.msra.mxu3 %v629_v4  ;;  %v1085_v25 = vld [vmem:[%s1370_s9] ss:$0 sm:$0xff] }
  0x16   : > { %642 = vmatpush.msra.mxu0 %v629_v4  ;;  %1022 = vmatpush.msra.mxu1 %v629_v4  ;;  %v1086_v26 = vld [vmem:[%s1371_s10] ss:$0 sm:$0xff]  ;;  %v778_v27 = vmul.f32 %v1085_v25, %v773_v24 }
  0x17   : > { %1026 = vmatpush.msra.mxu2 %v628_v5  ;;  %1027 = vmatpush.msra.mxu3 %v628_v5  ;;  %v785_v29 = vld [vmem:[%s589_s30] sm:$0xff] }
  0x18   : > { %643 = vmatpush.msra.mxu0 %v628_v5  ;;  %1025 = vmatpush.msra.mxu1 %v628_v5  ;;  %v783_v28 = vadd.f32 %v1086_v26, %v778_v27  ;;  %v679_v32 = vld [vmem:[%s568_s16] sm:$0xff] }
  0x19   : > { %1029 = vmatpush.msra.mxu2 %v627_v6  ;;  %1030 = vmatpush.msra.mxu3 %v627_v6  ;;  %v682_v33 = vrot.slane %v679_v32, 2  ;;  %v1082_v34 = vld [vmem:[%s1365_s4] ss:$0 sm:$0xff]  ;;  %v688_v35 = vperm.slane %v679_v32, 0  ;;  %v684_v37 = vrot.slane %v679_v32, 4  ;;  %v686_v38 = vrot.slane %v679_v32, 6 }
  0x1a   : > { %644 = vmatpush.msra.mxu0 %v627_v6  ;;  %1028 = vmatpush.msra.mxu1 %v627_v6  ;;  %v784_v30 = vmax.f32 %v783_v28, 0.0  ;;  %v1303_v43 = vld [vmem:[%s575_s29] sm:$0xff]  ;;  %v681_v51 = vrot.slane %v679_v32, 1  ;;  %v683_v52 = vrot.slane %v679_v32, 3  ;;  %v685_v2 = vrot.slane %v679_v32, 5 }
  0x1b   : > { %1032 = vmatpush.msra.mxu2 %v626_v7  ;;  %1033 = vmatpush.msra.mxu3 %v626_v7  ;;  %v690_v36 = vperm.slane %v682_v33, 0  ;;  %v1308_v45 = vld [vmem:[%s1366_s5] ss:$0 sm:$0xff]  ;;  %v692_v47 = vperm.slane %v684_v37, 0  ;;  %v694_v48 = vperm.slane %v686_v38, 0  ;;  %v687_v3 = vrot.slane %v679_v32, 7 }
  0x1c   : > { %645 = vmatpush.msra.mxu0 %v626_v7  ;;  %1031 = vmatpush.msra.mxu1 %v626_v7  ;;  %v786_v31 = vadd.f32 %v785_v29, %v784_v30  ;;  %v1084_v54 = vld [vmem:[%s1367_s6] ss:$0 sm:$0xff]  ;;  %v689_v63 = vperm.slane %v681_v51, 0  ;;  %v691_v1 = vperm.slane %v683_v52, 0  ;;  %v693_v25 = vperm.slane %v685_v2, 0 }
  0x1d   : > { %1035 = vmatpush.msra.mxu2 %v625_v8  ;;  %1036 = vmatpush.msra.mxu3 %v625_v8  ;;  %v695_v27 = vperm.slane %v687_v3, 0 }
  0x1e   : > { %646 = vmatpush.msra.mxu0 %v625_v8  ;;  %1034 = vmatpush.msra.mxu1 %v625_v8  ;;  %787 = vst [vmem:[%s609_s20] sm:$0xff] %v786_v31 }
  0x1f   : > { %1038 = vmatpush.msra.mxu2 %v624_v9  ;;  %1039 = vmatpush.msra.mxu3 %v624_v9 }
  0x20   : > { %647 = vmatpush.msra.mxu0 %v624_v9  ;;  %1037 = vmatpush.msra.mxu1 %v624_v9 }
  0x21   : > { %1041 = vmatpush.msra.mxu2 %v623_v10  ;;  %1042 = vmatpush.msra.mxu3 %v623_v10 }
  0x22   : > { %648 = vmatpush.msra.mxu0 %v623_v10  ;;  %1040 = vmatpush.msra.mxu1 %v623_v10 }
  0x23   : > { %1044 = vmatpush.msra.mxu2 %v622_v11  ;;  %1045 = vmatpush.msra.mxu3 %v622_v11 }
  0x24   : > { %649 = vmatpush.msra.mxu0 %v622_v11  ;;  %1043 = vmatpush.msra.mxu1 %v622_v11 }
  0x25   : > { %1047 = vmatpush.msra.mxu2 %v621_v12  ;;  %1048 = vmatpush.msra.mxu3 %v621_v12 }
  0x26   : > { %650 = vmatpush.msra.mxu0 %v621_v12  ;;  %1046 = vmatpush.msra.mxu1 %v621_v12 }
  0x27   : > { %1050 = vmatpush.msra.mxu2 %v620_v13  ;;  %1051 = vmatpush.msra.mxu3 %v620_v13 }
  0x28   : > { %651 = vmatpush.msra.mxu0 %v620_v13  ;;  %1049 = vmatpush.msra.mxu1 %v620_v13 }
  0x29   : > { %1053 = vmatpush.msra.mxu2 %v619_v14  ;;  %1054 = vmatpush.msra.mxu3 %v619_v14 }
  0x2a   : > { %652 = vmatpush.msra.mxu0 %v619_v14  ;;  %1052 = vmatpush.msra.mxu1 %v619_v14 }
  0x2b   : > { %1056 = vmatpush.msra.mxu2 %v618_v15  ;;  %1057 = vmatpush.msra.mxu3 %v618_v15 }
  0x2c   : > { %666 = vmatmul.f32.vlgmr.msra.gmra.mxu2 %v1254_v16  ;;  %672 = vmatmul.f32.vlgmr.msra.gmra.mxu3 %v1256_v17 }
  0x2d   : > { %653 = vmatpush.msra.mxu0 %v618_v15  ;;  %1055 = vmatpush.msra.mxu1 %v618_v15 }
  0x2e   : > { %654 = vmatmul.f32.vlgmr.msra.gmra.mxu0 %v1258_v18  ;;  %660 = vmatmul.f32.vlgmr.msra.gmra.mxu1 %v1260_v19 }
  0x34   : > { %669 = vmatmul.f32.gmra.mxu2 %v1266_v20  ;;  %675 = vmatmul.f32.gmra.mxu3 %v1268_v21 }
  0x36   : > { %657 = vmatmul.f32.gmra.mxu0 %v1270_v22  ;;  %663 = vmatmul.f32.gmra.mxu1 %v1272_v23 }
  0xab   : > { %v655_v39 = vpop.f32.mrf.mxu0  ;;  %v661_v40 = vpop.f32.mrf.mxu1 }
  0xac   : > { %v656_v41 = vadd.f32 %v1082_v34, %v655_v39  ;;  %v662_v42 = vadd.f32 %v1082_v34, %v661_v40 }
  0xae   : > { %v704_v44 = vadd.f32 %v688_v35, %v656_v41  ;;  %v706_v46 = vadd.f32 %v690_v36, %v662_v42 }
  0xaf   : > { %v667_v49 = vpop.f32.mrf.mxu2  ;;  %v673_v50 = vpop.f32.mrf.mxu3 }
  0xb0   : > { %v713_v53 = vadd.f32 %v1303_v43, %v704_v44  ;;  %v715_v55 = vadd.f32 %v1303_v43, %v706_v46  ;;  %v668_v56 = vadd.f32 %v1082_v34, %v667_v49  ;;  %v674_v57 = vadd.f32 %v1082_v34, %v673_v50 }
  0xb2   : > { %v725_v58 = vmul.f32 %v1308_v45, %v713_v53  ;;  %v727_v59 = vmul.f32 %v1308_v45, %v715_v55  ;;  %v708_v60 = vadd.f32 %v692_v47, %v668_v56  ;;  %v710_v61 = vadd.f32 %v694_v48, %v674_v57 }
  0xb3   : > { %v658_v62 = vpop.f32.mrf.mxu0  ;;  %v664_v0 = vpop.f32.mrf.mxu1 }
  0xb4   : > { %v737_v4 = vadd.f32 %v1084_v54, %v725_v58  ;;  %v739_v5 = vadd.f32 %v1084_v54, %v727_v59  ;;  %v717_v6 = vadd.f32 %v1303_v43, %v708_v60  ;;  %v719_v7 = vadd.f32 %v1303_v43, %v710_v61 }
  0xb5   : > { %v659_v8 = vadd.f32 %v1082_v34, %v658_v62  ;;  %v665_v9 = vadd.f32 %v1082_v34, %v664_v0 }
  0xb6   : > { %v745_v10 = vmax.f32 %v737_v4, 0.0  ;;  %v747_v11 = vmax.f32 %v739_v5, 0.0  ;;  %v729_v12 = vmul.f32 %v1308_v45, %v717_v6  ;;  %v731_v13 = vmul.f32 %v1308_v45, %v719_v7 }
  0xb7   : > { %v705_v14 = vadd.f32 %v689_v63, %v659_v8  ;;  %v707_v15 = vadd.f32 %v691_v1, %v665_v9  ;;  %v670_v24 = vpop.f32.mrf.mxu2  ;;  %v676_v26 = vpop.f32.mrf.mxu3 }
  0xb8   : > { %v753_v28 = vadd.f32 %v745_v10, %v1258_v18  ;;  %v755_v29 = vadd.f32 %v747_v11, %v1260_v19  ;;  %v741_v30 = vadd.f32 %v1084_v54, %v729_v12  ;;  %v743_v31 = vadd.f32 %v1084_v54, %v731_v13 }
  0xb9   : > { %v714_v32 = vadd.f32 %v1303_v43, %v705_v14  ;;  %v716_v33 = vadd.f32 %v1303_v43, %v707_v15  ;;  %v671_v35 = vadd.f32 %v1082_v34, %v670_v24  ;;  %v677_v36 = vadd.f32 %v1082_v34, %v676_v26 }
  0xba   : > { %761 = vst [vmem:[%s1326_s18] sm:$0xff] %v753_v28  ;;  %v749_v37 = vmax.f32 %v741_v30, 0.0  ;;  %v751_v38 = vmax.f32 %v743_v31, 0.0 }
  0xbb   : > { %763 = vst [vmem:[%s1326_s18 + $0x10] sm:$0xff] %v755_v29  ;;  %v726_v39 = vmul.f32 %v1308_v45, %v714_v32  ;;  %v728_v18 = vmul.f32 %v1308_v45, %v716_v33  ;;  %v709_v40 = vadd.f32 %v693_v25, %v671_v35  ;;  %v711_v19 = vadd.f32 %v695_v27, %v677_v36 }
  0xbc   : > { %v757_v41 = vadd.f32 %v749_v37, %v1254_v16  ;;  %v759_v42 = vadd.f32 %v751_v38, %v1256_v17 }
  0xbd   : > { %v738_v44 = vadd.f32 %v1084_v54, %v726_v39  ;;  %v740_v46 = vadd.f32 %v1084_v54, %v728_v18  ;;  %v718_v34 = vadd.f32 %v1303_v43, %v709_v40  ;;  %v720_v47 = vadd.f32 %v1303_v43, %v711_v19 }
  0xbe   : > { %765 = vst [vmem:[%s1326_s18 + $0x20] sm:$0xff] %v757_v41 }
  0xbf   : > { %767 = vst [vmem:[%s1326_s18 + $0x30] sm:$0xff] %v759_v42  ;;  %v746_v48 = vmax.f32 %v738_v44, 0.0  ;;  %v748_v49 = vmax.f32 %v740_v46, 0.0  ;;  %v730_v50 = vmul.f32 %v1308_v45, %v718_v34  ;;  %v732_v16 = vmul.f32 %v1308_v45, %v720_v47 }
  0xc1   : > { %v754_v51 = vadd.f32 %v746_v48, %v1270_v22  ;;  %v756_v17 = vadd.f32 %v748_v49, %v1272_v23  ;;  %v742_v52 = vadd.f32 %v1084_v54, %v730_v50  ;;  %v744_v53 = vadd.f32 %v1084_v54, %v732_v16 }
  0xc3   : > { %762 = vst [vmem:[%s1326_s18 + $0x8] sm:$0xff] %v754_v51  ;;  %v750_v55 = vmax.f32 %v742_v52, 0.0  ;;  %v752_v56 = vmax.f32 %v744_v53, 0.0 }
  0xc4   : > { %764 = vst [vmem:[%s1326_s18 + $0x18] sm:$0xff] %v756_v17 }
  0xc5   : > { %v758_v43 = vadd.f32 %v750_v55, %v1266_v20  ;;  %v760_v57 = vadd.f32 %v752_v56, %v1268_v21 }
  0xc7   : > { %766 = vst [vmem:[%s1326_s18 + $0x28] sm:$0xff] %v758_v43 }
  0xc8   : > { %768 = vst [vmem:[%s1326_s18 + $0x38] sm:$0xff] %v760_v57 }
  0xc9 PF: > { %s23_s23 = sadd.s32 1, %s1109_s23   ;;  %s1374_s21 = smov %s1105_s22 }
  0xca   : > { %p20_p5 = scmp.ge.s32.totalorder %s23_s23, 4   ;;  %s1375_s22 = smov %s1377_s24 }
  0xcc   :  { %22 = sbr.rel (!%p20_p5) target bundleno = 2 (0x2), region = 122 }

// kernel: residual_gated_gcn_layer.4
= control target key start
LH: loop header
LB: loop body
LE: loop exit
PB: predicated region body
PF: predicated region fallthrough
CT: control target
= control target key end

     0   :  { %s1460_s30 = smov 0   ;;  %s1462_s10 = smov 0   ;;  %s1860_s0 = inlined_call_operand.vmem [shape: f32[2,8,8,128], index: 0, kind: input, shape index: {}]   ;;  %s1861_s1 = inlined_call_operand.vmem [shape: f32[2,8,128], index: 1, kind: input, shape index: {}, may-alias: {1,2}]   ;;  %s1862_s2 = inlined_call_operand.vmem [shape: f32[2,8,128], index: 2, kind: input, shape index: {}, may-alias: {1,2}]   ;;  %s1863_s3 = inlined_call_operand.vmem [shape: f32[2,8,128], index: 3, kind: input, shape index: {}]   ;;  %s1864_s4 = inlined_call_operand.vmem [shape: f32[2,8,128], index: 4, kind: input, shape index: {}]   ;;  %s1865_s5 = inlined_call_operand.vmem [shape: f32[128,128], index: 5, kind: input, shape index: {}]   ;;  %s1866_s6 = inlined_call_operand.vmem [shape: f32[1,128], index: 6, kind: input, shape index: {}]   ;;  %s1867_s7 = inlined_call_operand.vmem [shape: f32[2,8,128], index: 7, kind: output, shape index: {0}]   ;;  %s1868_s8 = inlined_call_operand.vmem [shape: f32[2,8,128], index: 8, kind: output, shape index: {1}]   ;;  %s1869_s9 = inlined_call_operand.vmem [shape: f32[2,8,128], index: 9, kind: output, shape index: {2}]  }
   0x1   :  { %s1464_s11 = smov 0  }
   0x2 LB: > { %s39_s12 = sadd.s32 1, %s1404_s10  ;;  %p1259_p0 = scmp.ge.s32.totalorder %s1408_s11, 1  ;;  %s1408_s11 = sphi %s1464_s11, %s20_s11   ;;  %s1404_s10 = sphi %s1462_s10, %s1889_s10   ;;  %s1400_s30 = sphi %s1460_s30, %s1888_s30  }
   0x3   : > { %p41_p1 = scmp.ge.s32.totalorder %s39_s12, 2  ;;  %p385_p2 = scmp.lt.s32.totalorder %s1408_s11, 3 }
   0x5   : > { %s1891_s12 = smov (%p41_p1, %s39_s12), 0  ;;  %p386_p3 = pnand %p1259_p0, %p385_p2 }
   0x6   : > { %p473_p4 = scmp.lt.s32.totalorder (!%p386_p3), %s1400_s30, 1 }
   0x7   : > { %389 = sbr.rel (%p386_p3) target bundleno = 277 (0x115), region = 48 }
   0xc   : > { %v557_v0 = vld [vmem:[%s1865_s5 + $0x78] sm:$0xff]  ;;  %v556_v1 = vld [vmem:[%s1865_s5 + $0x70] sm:$0xff]  ;;  %v555_v2 = vld [vmem:[%s1865_s5 + $0x68] sm:$0xff]  ;;  %s1893_s30 = smov (!%p473_p4, %s1400_s30), 1 }
   0xd   : > { %562 = vmatpush.msra.mxu0 %v557_v0  ;;  %1280 = vmatpush.msra.mxu1 %v557_v0  ;;  %v554_v3 = vld [vmem:[%s1865_s5 + $0x60] sm:$0xff]  ;;  %v553_v4 = vld [vmem:[%s1865_s5 + $0x58] sm:$0xff]  ;;  %v552_v5 = vld [vmem:[%s1865_s5 + $0x50] sm:$0xff]  ;;  %s1279_s24 = sshll.u32 %s1893_s30, 6  ;;  %s1537_s15 = sshll.u32 %s1893_s30, 3 }
   0xe   : > { %1281 = vmatpush.msra.mxu2 %v557_v0  ;;  %1282 = vmatpush.msra.mxu3 %v557_v0  ;;  %v551_v6 = vld [vmem:[%s1865_s5 + $0x48] sm:$0xff]  ;;  %v550_v7 = vld [vmem:[%s1865_s5 + $0x40] sm:$0xff]  ;;  %v549_v8 = vld [vmem:[%s1865_s5 + $0x38] sm:$0xff]  ;;  %s483_s29 = scalar_lea.vmem %s1860_s0, %s1279_s24  ;;  %s491_s18 = scalar_lea.vmem %s1861_s1, %s1537_s15 }
   0xf   : > { %563 = vmatpush.msra.mxu0 %v556_v1  ;;  %1283 = vmatpush.msra.mxu1 %v556_v1  ;;  %v548_v9 = vld [vmem:[%s1865_s5 + $0x30] sm:$0xff]  ;;  %v547_v10 = vld [vmem:[%s1865_s5 + $0x28] sm:$0xff]  ;;  %v546_v11 = vld [vmem:[%s1865_s5 + $0x20] sm:$0xff]  ;;  %s498_s30 = scalar_lea.vmem %s1862_s2, %s1537_s15  ;;  %s505_s25 = scalar_lea.vmem %s1863_s3, %s1537_s15 }
  0x10   : > { %1284 = vmatpush.msra.mxu2 %v556_v1  ;;  %1285 = vmatpush.msra.mxu3 %v556_v1  ;;  %v545_v12 = vld [vmem:[%s1865_s5 + $0x18] sm:$0xff]  ;;  %v544_v13 = vld [vmem:[%s1865_s5 + $0x10] sm:$0xff]  ;;  %v543_v14 = vld [vmem:[%s1865_s5 + $0x8] sm:$0xff]  ;;  %s526_s28 = scalar_lea.vmem %s1868_s8, %s1537_s15  ;;  %s533_s14 = scalar_lea.vmem %s1869_s9, %s1537_s15 }
  0x11   : > { %564 = vmatpush.msra.mxu0 %v555_v2  ;;  %1286 = vmatpush.msra.mxu1 %v555_v2  ;;  %v542_v15 = vld [vmem:[%s1865_s5] sm:$0xff]  ;;  %v536_v17 = vld [vmem:[%s483_s29 + $0x10] sm:$0xff]  ;;  %v535_v20 = vld [vmem:[%s483_s29 + $0x8] sm:$0xff]  ;;  %s519_s21 = scalar_lea.vmem %s1867_s7, %s1537_s15 }
  0x12   : > { %1287 = vmatpush.msra.mxu2 %v555_v2  ;;  %1288 = vmatpush.msra.mxu3 %v555_v2  ;;  %v534_v16 = vld [vmem:[%s483_s29] sm:$0xff]  ;;  %v540_v19 = vld [vmem:[%s483_s29 + $0x30] sm:$0xff]  ;;  %v537_v21 = vld [vmem:[%s483_s29 + $0x18] sm:$0xff] }
  0x13   : > { %565 = vmatpush.msra.mxu0 %v554_v3  ;;  %1289 = vmatpush.msra.mxu1 %v554_v3  ;;  %v538_v18 = vld [vmem:[%s483_s29 + $0x20] sm:$0xff]  ;;  %v539_v22 = vld [vmem:[%s483_s29 + $0x28] sm:$0xff]  ;;  %v541_v23 = vld [vmem:[%s483_s29 + $0x38] sm:$0xff] }
  0x14   : > { %1290 = vmatpush.msra.mxu2 %v554_v3  ;;  %1291 = vmatpush.msra.mxu3 %v554_v3  ;;  %v1543_v24 = vld [vmem:[%s491_s18] sm:$0xff]  ;;  %s512_s18 = scalar_lea.vmem %s1864_s4, %s1537_s15 }
  0x15   : > { %566 = vmatpush.msra.mxu0 %v553_v4  ;;  %1292 = vmatpush.msra.mxu1 %v553_v4  ;;  %v606_v25 = vrot.slane %v1543_v24, 2  ;;  %v1549_v26 = vld [vmem:[%s1866_s6] ss:$0 sm:$0xff]  ;;  %v612_v27 = vperm.slane %v1543_v24, 0  ;;  %v608_v34 = vrot.slane %v1543_v24, 4  ;;  %v610_v39 = vrot.slane %v1543_v24, 6 }
  0x16   : > { %1293 = vmatpush.msra.mxu2 %v553_v4  ;;  %1294 = vmatpush.msra.mxu3 %v553_v4  ;;  %v1558_v33 = vld [vmem:[%s498_s30] sm:$0xff]  ;;  %v605_v50 = vrot.slane %v1543_v24, 1 }
  0x17   : > { %567 = vmatpush.msra.mxu0 %v552_v5  ;;  %1295 = vmatpush.msra.mxu1 %v552_v5  ;;  %v614_v28 = vperm.slane %v606_v25, 0  ;;  %v616_v40 = vperm.slane %v608_v34, 0  ;;  %v618_v48 = vperm.slane %v610_v39, 0 }
  0x18   : > { %1296 = vmatpush.msra.mxu2 %v552_v5  ;;  %1297 = vmatpush.msra.mxu3 %v552_v5  ;;  %v613_v58 = vperm.slane %v605_v50, 0 }
  0x19   : > { %568 = vmatpush.msra.mxu0 %v551_v6  ;;  %1298 = vmatpush.msra.mxu1 %v551_v6 }
  0x1a   : > { %1299 = vmatpush.msra.mxu2 %v551_v6  ;;  %1300 = vmatpush.msra.mxu3 %v551_v6 }
  0x1b   : > { %569 = vmatpush.msra.mxu0 %v550_v7  ;;  %1301 = vmatpush.msra.mxu1 %v550_v7 }
  0x1c   : > { %1302 = vmatpush.msra.mxu2 %v550_v7  ;;  %1303 = vmatpush.msra.mxu3 %v550_v7 }
  0x1d   : > { %570 = vmatpush.msra.mxu0 %v549_v8  ;;  %1304 = vmatpush.msra.mxu1 %v549_v8 }
  0x1e   : > { %1305 = vmatpush.msra.mxu2 %v549_v8  ;;  %1306 = vmatpush.msra.mxu3 %v549_v8 }
  0x1f   : > { %571 = vmatpush.msra.mxu0 %v548_v9  ;;  %1307 = vmatpush.msra.mxu1 %v548_v9 }
  0x20   : > { %1308 = vmatpush.msra.mxu2 %v548_v9  ;;  %1309 = vmatpush.msra.mxu3 %v548_v9 }
  0x21   : > { %572 = vmatpush.msra.mxu0 %v547_v10  ;;  %1310 = vmatpush.msra.mxu1 %v547_v10 }
  0x22   : > { %1311 = vmatpush.msra.mxu2 %v547_v10  ;;  %1312 = vmatpush.msra.mxu3 %v547_v10 }
  0x23   : > { %573 = vmatpush.msra.mxu0 %v546_v11  ;;  %1313 = vmatpush.msra.mxu1 %v546_v11 }
  0x24   : > { %1314 = vmatpush.msra.mxu2 %v546_v11  ;;  %1315 = vmatpush.msra.mxu3 %v546_v11 }
  0x25   : > { %574 = vmatpush.msra.mxu0 %v545_v12  ;;  %1316 = vmatpush.msra.mxu1 %v545_v12 }
  0x26   : > { %1317 = vmatpush.msra.mxu2 %v545_v12  ;;  %1318 = vmatpush.msra.mxu3 %v545_v12 }
  0x27   : > { %575 = vmatpush.msra.mxu0 %v544_v13  ;;  %1319 = vmatpush.msra.mxu1 %v544_v13 }
  0x28   : > { %1320 = vmatpush.msra.mxu2 %v544_v13  ;;  %1321 = vmatpush.msra.mxu3 %v544_v13 }
  0x29   : > { %576 = vmatpush.msra.mxu0 %v543_v14  ;;  %1322 = vmatpush.msra.mxu1 %v543_v14 }
  0x2a   : > { %1323 = vmatpush.msra.mxu2 %v543_v14  ;;  %1324 = vmatpush.msra.mxu3 %v543_v14 }
  0x2b   : > { %577 = vmatpush.msra.mxu0 %v542_v15  ;;  %1325 = vmatpush.msra.mxu1 %v542_v15 }
  0x2c   : > { %1326 = vmatpush.msra.mxu2 %v542_v15  ;;  %1327 = vmatpush.msra.mxu3 %v542_v15 }
  0x2d   : > { %578 = vmatmul.f32.vlgmr.msra.gmra.mxu0 %v534_v16  ;;  %584 = vmatmul.f32.vlgmr.msra.gmra.mxu1 %v536_v17 }
  0x2e   : > { %590 = vmatmul.f32.vlgmr.msra.gmra.mxu2 %v538_v18  ;;  %596 = vmatmul.f32.vlgmr.msra.gmra.mxu3 %v540_v19 }
  0x35   : > { %581 = vmatmul.f32.gmra.mxu0 %v535_v20  ;;  %587 = vmatmul.f32.gmra.mxu1 %v537_v21 }
  0x36   : > { %593 = vmatmul.f32.gmra.mxu2 %v539_v22  ;;  %599 = vmatmul.f32.gmra.mxu3 %v541_v23  ;;  %v607_v22 = vrot.slane %v1543_v24, 3 }
  0x38   : > { %v1595_v39 = vperm.slane %v607_v22, 0 }
  0xaa   : > { %v579_v29 = vpop.f32.mrf.mxu0  ;;  %v585_v30 = vpop.f32.mrf.mxu1 }
  0xab   : > { %v580_v31 = vadd.f32 %v1549_v26, %v579_v29  ;;  %v586_v32 = vadd.f32 %v1549_v26, %v585_v30 }
  0xad   : > { %v628_v35 = vadd.f32 %v612_v27, %v580_v31  ;;  %v630_v36 = vadd.f32 %v614_v28, %v586_v32 }
  0xaf   : > { %v637_v37 = vadd.f32 %v1558_v33, %v628_v35  ;;  %v639_v38 = vadd.f32 %v1558_v33, %v630_v36 }
  0xb1   : > { %v1269_v41 = vmul.f32 -1.442695, %v637_v37  ;;  %v1271_v42 = vmul.f32 -1.442695, %v639_v38  ;;  %v591_v43 = vpop.f32.mrf.mxu2  ;;  %v597_v44 = vpop.f32.mrf.mxu3  ;;  %v902_v46 = vmul.f32 %v637_v37, %v637_v37  ;;  %v854_v52 = vrot.slane %v637_v37, 4 }
  0xb2   : > { %v592_v45 = vadd.f32 %v1549_v26, %v591_v43  ;;  %v598_v47 = vadd.f32 %v1549_v26, %v597_v44  ;;  %v582_v51 = vpop.f32.mrf.mxu0  ;;  %v866_v60 = vrot.slane %v639_v38, 4  ;;  %v904_v0 = vmul.f32 %v639_v38, %v639_v38  ;;  %v588_v29 = vpop.f32.mrf.mxu1 }
  0xb3   : > { %1354 = vpow2.f32 %v1269_v41  ;;  %v910_v54 = vrot.slane %v902_v46, 4  ;;  %v583_v57 = vadd.f32 %v1549_v26, %v582_v51  ;;  %v855_v63 = vadd.f32 %v854_v52, %v637_v37 }
  0xb4   : > { %1356 = vpow2.f32 %v1271_v42  ;;  %v632_v49 = vadd.f32 %v616_v40, %v592_v45  ;;  %v634_v55 = vadd.f32 %v618_v48, %v598_v47  ;;  %v867_v5 = vadd.f32 %v866_v60, %v639_v38 }
  0xb5   : > { %v911_v1 = vadd.f32 %v910_v54, %v902_v46  ;;  %v629_v4 = vadd.f32 %v613_v58, %v583_v57  ;;  %v856_v6 = vrot.slane %v855_v63, 2  ;;  %v922_v7 = vrot.slane %v904_v0, 4 }
  0xb6   : > { %v641_v53 = vadd.f32 %v1558_v33, %v632_v49  ;;  %v643_v3 = vadd.f32 %v1558_v33, %v634_v55  ;;  %v868_v14 = vrot.slane %v867_v5, 2  ;;  %v1593_v38 = vadd.f32 %v1549_v26, %v588_v29 }
  0xb7   : > { %v912_v8 = vrot.slane %v911_v1, 2  ;;  %v1577_v13 = vadd.f32 %v1558_v33, %v629_v4  ;;  %v857_v16 = vadd.f32 %v856_v6, %v855_v63  ;;  %v923_v17 = vadd.f32 %v922_v7, %v904_v0 }
  0xb8   : > { %v1273_v56 = vmul.f32 -1.442695, %v641_v53  ;;  %v1275_v9 = vmul.f32 -1.442695, %v643_v3  ;;  %v878_v11 = vrot.slane %v641_v53, 4  ;;  %v906_v12 = vmul.f32 %v641_v53, %v641_v53 }
  0xb9   : > { %v1355_v59 = vpop.eup %1354  ;;  %v913_v21 = vadd.f32 %v912_v8, %v911_v1  ;;  %v1270_v28 = vmul.f32 -1.442695, %v1577_v13  ;;  %v869_v31 = vadd.f32 %v868_v14, %v867_v5  ;;  %v890_v32 = vrot.slane %v643_v3, 4 }
  0xba   : > { %v1357_v61 = vpop.eup %1356  ;;  %v1569_v62 = vadd.f32 1.0, %v1355_v59  ;;  %1358 = vpow2.f32 %v1273_v56  ;;  %v879_v25 = vadd.f32 %v878_v11, %v641_v53  ;;  %v934_v27 = vrot.slane %v906_v12, 4 }
  0xbb   : > { %v1571_v2 = vadd.f32 1.0, %v1357_v61  ;;  %v858_v34 = vrot.slane %v857_v16, 1  ;;  %v924_v35 = vrot.slane %v923_v17, 2  ;;  %v914_v36 = vrot.slane %v913_v21, 1 }
  0xbc   : > { %1360 = vrcp.f32 %v1569_v62  ;;  %v686_v40 = vand.u32 2147483647, %v1569_v62  ;;  %v880_v41 = vrot.slane %v879_v25, 2  ;;  %v935_v42 = vadd.f32 %v934_v27, %v906_v12  ;;  %v1662_v27 = vld [vmem:[%s505_s25] sm:$0xff] }
  0xbd   : > { %1362 = vrcp.f32 %v1571_v2  ;;  %v688_v45 = vand.u32 2147483648, %v1569_v62  ;;  %v870_v46 = vrot.slane %v869_v31, 1  ;;  %v891_v47 = vadd.f32 %v890_v32, %v643_v3 }
  0xbe   : > { %1364 = vpow2.f32 %v1275_v9  ;;  %vm682_vm0 = vweird.f32 %v1569_v62  ;;  %v1601_v48 = vadd.f32 %v858_v34, %v857_v16  ;;  %v925_v49 = vadd.f32 %v924_v35, %v923_v17 }
  0xbf   : > { %v908_v50 = vmul.f32 %v643_v3, %v643_v3  ;;  %v1603_v51 = vadd.f32 %v914_v36, %v913_v21  ;;  %vm712_vm1 = vweird.f32 %v1571_v2  ;;  %v716_v53 = vand.u32 2147483647, %v1571_v2 }
  0xc0   : > { %v1359_v10 = vpop.eup %1358  ;;  %vm1610_vm2 = vcmp.eq.f32.partialorder %v686_v40, 8.507059e+37  ;;  %v881_v56 = vadd.f32 %v880_v41, %v879_v25  ;;  %v936_v57 = vrot.slane %v935_v42, 2  ;;  %v689_v60 = vor.u32 1.1754944e-38, %v688_v45 }
  0xc1   : > { %v1581_v18 = vadd.f32 1.0, %v1359_v10  ;;  %v892_v61 = vrot.slane %v891_v47, 2  ;;  %v718_v0 = vand.u32 2147483648, %v1571_v2  ;;  %v926_v1 = vrot.slane %v925_v49, 1 }
  0xc2   : > { %v1579_v15 = vpop.eup %1360  ;;  %v946_v3 = vrot.slane %v908_v50, 4  ;;  %v860_v4 = vrot.slane %v1577_v13, 4  ;;  %v882_v10 = vrot.slane %v881_v56, 1  ;;  %v937_v11 = vadd.f32 %v936_v57, %v935_v42 }
  0xc3   : > { %v1583_v19 = vpop.eup %1362  ;;  %v678_v20 = vmul.f32 %v1579_v15, %v1569_v62  ;;  %1366 = vrcp.f32 %v1581_v18  ;;  %vm683_vm3 = vweird.f32 %v1579_v15  ;;  %v748_v9 = vand.u32 2147483648, %v1581_v18 }
  0xc4   : > { %v708_v23 = vmul.f32 %v1583_v19, %v1571_v2  ;;  %1368 = vpow2.f32 %v1270_v28  ;;  %v1365_v43 = vpop.eup %1364  ;;  %vm713_vm4 = vweird.f32 %v1583_v19  ;;  %vm1628_vm5 = vmor %vm682_vm0, %vm683_vm3  ;;  %v893_v14 = vadd.f32 %v892_v61, %v891_v47 }
  0xc5   : > { %v679_v30 = vsub.f32 1.0, %v678_v20  ;;  %v1614_v58 = vadd.f32 1.0, %v1365_v43  ;;  %v903_v62 = vmul.f32 %v1577_v13, %v1577_v13  ;;  %vm1646_vm6 = vmor %vm712_vm1, %vm713_vm4  ;;  %vm1650_vm7 = vcmp.eq.f32.partialorder %v716_v53, 8.507059e+37 }
  0xc6   : > { %v709_v37 = vsub.f32 1.0, %v708_v23  ;;  %v1654_v20 = vadd.f32 %v870_v46, %v869_v31  ;;  %v947_v21 = vadd.f32 %v946_v3, %v908_v50  ;;  %v719_v23 = vor.u32 1.1754944e-38, %v718_v0 }
  0xc7   : > { %v680_v44 = vmul.f32 %v1579_v15, %v679_v30  ;;  %1370 = vrcp.f32 %v1614_v58  ;;  %v1660_v25 = vadd.f32 %v926_v1, %v925_v49  ;;  %v746_v29 = vand.u32 2147483647, %v1581_v18 }
  0xc8   : > { %v710_v52 = vmul.f32 %v1583_v19, %v709_v37  ;;  %v938_v30 = vrot.slane %v937_v11, 1  ;;  %v778_v31 = vand.u32 2147483648, %v1614_v58  ;;  %v1668_v32 = vor.u32 1.1754944e-38, %v748_v9 }
  0xc9   : > { %v1608_v54 = vpop.eup %1366  ;;  %v681_v59 = vadd.f32 %v1579_v15, %v680_v44  ;;  %v894_v34 = vrot.slane %v893_v14, 1  ;;  %v948_v37 = vrot.slane %v947_v21, 2  ;;  %v631_v41 = vadd.f32 %v1595_v39, %v1593_v38 }
  0xca   : > { %v1369_v63 = vpop.eup %1368  ;;  %v711_v5 = vadd.f32 %v1583_v19, %v710_v52  ;;  %v738_v6 = vmul.f32 %v1608_v54, %v1581_v18  ;;  %vm742_vm8 = vweird.f32 %v1581_v18  ;;  %vm743_vm9 = vweird.f32 %v1608_v54 }
  0xcb   : > { %v1624_v7 = vadd.f32 1.0, %v1369_v63  ;;  %v685_v12 = vsel %vm1628_vm5, %v1579_v15, %v681_v59  ;;  %v861_v15 = vadd.f32 %v860_v4, %v1577_v13  ;;  %v1670_v13 = vadd.f32 %v882_v10, %v881_v56  ;;  %v594_v10 = vpop.f32.mrf.mxu2  ;;  %vm1706_vm14 = vmor %vm742_vm8, %vm743_vm9 }
  0xcc   : > { %v715_v22 = vsel %vm1646_vm6, %v1583_v19, %v711_v5  ;;  %v739_v2 = vsub.f32 1.0, %v738_v6  ;;  %v690_v28 = vsel %vm1610_vm2, %v689_v60, %v685_v12  ;;  %v916_v19 = vrot.slane %v903_v62, 4 }
  0xcd   : > { %1372 = vrcp.f32 %v1624_v7  ;;  %v1672_v35 = vpop.eup %1370  ;;  %v720_v36 = vsel %vm1650_vm7, %v719_v23, %v715_v22  ;;  %v862_v40 = vrot.slane %v861_v15, 2  ;;  %v798_v43 = vmul.f32 %v1662_v27, %v690_v28 }
  0xce   : > { %v740_v44 = vmul.f32 %v1608_v54, %v739_v2  ;;  %v917_v45 = vadd.f32 %v916_v19, %v903_v62  ;;  %v1682_v46 = vadd.f32 %v938_v30, %v937_v11  ;;  %v776_v47 = vand.u32 2147483647, %v1614_v58 }
  0xcf   : > { %v1685_v49 = vor.u32 1.1754944e-38, %v778_v31  ;;  %v800_v38 = vmul.f32 %v1662_v27, %v720_v36  ;;  %v768_v39 = vmul.f32 %v1672_v35, %v1614_v58  ;;  %v1691_v52 = vadd.f32 %v894_v34, %v893_v14 }
  0xd0   : > { %v918_v53 = vrot.slane %v917_v45, 2  ;;  %v949_v55 = vadd.f32 %v948_v37, %v947_v21  ;;  %v863_v57 = vadd.f32 %v862_v40, %v861_v15  ;;  %v640_v59 = vadd.f32 %v1558_v33, %v631_v41 }
  0xd1   : > { %v806_v60 = vrot.slane %v798_v43, 4  ;;  %v741_v61 = vadd.f32 %v1608_v54, %v740_v44  ;;  %vm1695_vm10 = vcmp.eq.f32.partialorder %v746_v29, 8.507059e+37  ;;  %v701_v0 = vand.u32 2147483647, %v1624_v7 }
  0xd2   : > { %v703_v1 = vand.u32 2147483648, %v1624_v7  ;;  %v1272_v4 = vmul.f32 -1.442695, %v640_v59  ;;  %v872_v5 = vrot.slane %v640_v59, 4  ;;  %v769_v6 = vsub.f32 1.0, %v768_v39 }
  0xd3   : > { %v1373_v42 = vpop.eup %1372  ;;  %vm697_vm12 = vweird.f32 %v1624_v7  ;;  %v919_v8 = vadd.f32 %v918_v53, %v917_v45  ;;  %v905_v9 = vmul.f32 %v640_v59, %v640_v59  ;;  %v864_v12 = vrot.slane %v863_v57, 1  ;;  %v600_v45 = vpop.f32.mrf.mxu3 }
  0xd4   : > { %v693_v50 = vmul.f32 %v1373_v42, %v1624_v7  ;;  %vm698_vm11 = vweird.f32 %v1373_v42  ;;  %1374 = vpow2.f32 %v1272_v4  ;;  %v873_v14 = vadd.f32 %v872_v5, %v640_v59 }
  0xd5   : > { %v818_v62 = vrot.slane %v800_v38, 4  ;;  %v950_v16 = vrot.slane %v949_v55, 1  ;;  %vm699_vm13 = vmor %vm697_vm12, %vm698_vm11  ;;  %v704_v17 = vor.u32 1.1754944e-38, %v703_v1  ;;  %v928_v21 = vrot.slane %v905_v9, 4 }
  0xd6   : > { %v694_v56 = vsub.f32 1.0, %v693_v50  ;;  %vm772_vm15 = vweird.f32 %v1614_v58  ;;  %vm702_vm0 = vcmp.eq.f32.partialorder %v701_v0, 8.507059e+37  ;;  %v595_v22 = vadd.f32 %v1549_v26, %v594_v10 }
  0xd7   : > { %v609_v23 = vrot.slane %v1543_v24, 5  ;;  %v745_v2 = vsel %vm1706_vm14, %v1608_v54, %v741_v61  ;;  %v920_v29 = vrot.slane %v919_v8, 1  ;;  %v874_v30 = vrot.slane %v873_v14, 2 }
  0xd8   : > { %v695_v3 = vmul.f32 %v1373_v42, %v694_v56  ;;  %v770_v18 = vmul.f32 %v1672_v35, %v769_v6  ;;  %v865_v31 = vadd.f32 %v864_v12, %v863_v57  ;;  %vm975_vm1 = vcmask 1041409  }
  0xd9   : > { %v617_v34 = vperm.slane %v609_v23, 0  ;;  %v1717_v19 = vadd.f32 %v806_v60, %v798_v43  ;;  %vm773_vm2 = vweird.f32 %v1672_v35  ;;  %v929_v36 = vadd.f32 %v928_v21, %v905_v9 }
  0xda   : > { %v696_v11 = vadd.f32 %v1373_v42, %v695_v3  ;;  %v611_v37 = vrot.slane %v1543_v24, 7  ;;  %v1375_v40 = vpop.eup %1374  ;;  %v1721_v41 = vadd.f32 %v818_v62, %v800_v38  ;;  %v1726_v54 = vsel %vm1695_vm10, %v1668_v32, %v745_v2  ;;  %vm1747_vm4 = vmor %vm772_vm15, %vm773_vm2 }
  0xdb   : > { %v633_v44 = vadd.f32 %v617_v34, %v595_v22  ;;  %v1729_v50 = vadd.f32 %v950_v16, %v949_v55  ;;  %v921_v43 = vadd.f32 %v920_v29, %v919_v8  ;;  %v1731_v39 = vadd.f32 1.0, %v1375_v40 }
  0xdc   : > { %v700_v7 = vsel %vm699_vm13, %v1373_v42, %v696_v11  ;;  %v875_v53 = vadd.f32 %v874_v30, %v873_v14  ;;  %v1734_v24 = vadd.f32 %v1672_v35, %v770_v18  ;;  %v1001_v38 = vsel %vm975_vm1, %v865_v31, %v1601_v48 }
  0xdd   : > { %v705_v28 = vsel %vm702_vm0, %v704_v17, %v700_v7  ;;  %vm977_vm3 = vcmask 1042434   ;;  %v642_v32 = vadd.f32 %v1558_v33, %v633_v44  ;;  %1376 = vrcp.f32 %v1731_v39 }
  0xde   : > { %v799_v42 = vmul.f32 %v1662_v27, %v705_v28  ;;  %v930_v56 = vrot.slane %v929_v36, 2  ;;  %v601_v57 = vadd.f32 %v1549_v26, %v600_v45  ;;  %v619_v55 = vperm.slane %v611_v37, 0 }
  0xdf   : > { %v820_v59 = vrot.slane %v1721_v41, 2  ;;  %v808_v60 = vrot.slane %v1717_v19, 2  ;;  %v1274_v63 = vmul.f32 -1.442695, %v642_v32  ;;  %v1020_v0 = vsel %vm975_vm1, %v921_v43, %v1603_v51 }
  0xe0   : > { %v812_v61 = vrot.slane %v799_v42, 4  ;;  %v876_v1 = vrot.slane %v875_v53, 1  ;;  %vm979_vm5 = vcmask 1043459   ;;  %v884_v26 = vrot.slane %v642_v32, 4 }
  0xe1   : > { %v775_v3 = vsel %vm1747_vm4, %v1672_v35, %v1734_v24  ;;  %v1002_v4 = vsel %vm977_vm3, %v1654_v20, %v1001_v38  ;;  %1378 = vpow2.f32 %v1274_v63  ;;  %v907_v5 = vmul.f32 %v642_v32, %v642_v32 }
  0xe2   : > { %v931_v6 = vadd.f32 %v930_v56, %v929_v36  ;;  %v885_v8 = vadd.f32 %v884_v26, %v642_v32  ;;  %vm981_vm6 = vcmask 1044484   ;;  %v635_v9 = vadd.f32 %v619_v55, %v601_v57 }
  0xe3   : > { %v1759_v10 = vadd.f32 %v812_v61, %v799_v42  ;;  %v1021_v51 = vsel %vm977_vm3, %v1660_v25, %v1020_v0  ;;  %v940_v11 = vrot.slane %v907_v5, 4  ;;  %vm983_vm7 = vcmask 1045509   ;;  %v1377_v12 = vpop.eup %1376 }
  0xe4   : > { %vm727_vm8 = vweird.f32 %v1731_v39  ;;  %v877_v35 = vadd.f32 %v876_v1, %v875_v53  ;;  %v886_v14 = vrot.slane %v885_v8, 2  ;;  %v644_v20 = vadd.f32 %v1558_v33, %v635_v9 }
  0xe5   : > { %vm1767_vm9 = vcmp.eq.f32.partialorder %v776_v47, 8.507059e+37  ;;  %v723_v16 = vmul.f32 %v1377_v12, %v1731_v39  ;;  %v731_v17 = vand.u32 2147483647, %v1731_v39  ;;  %v733_v25 = vand.u32 2147483648, %v1731_v39 }
  0xe6   : > { %v941_v21 = vadd.f32 %v940_v11, %v907_v5  ;;  %v932_v15 = vrot.slane %v931_v6, 1  ;;  %v887_v7 = vadd.f32 %v886_v14, %v885_v8  ;;  %v1276_v22 = vmul.f32 -1.442695, %v644_v20 }
  0xe7   : > { %v896_v23 = vrot.slane %v644_v20, 4  ;;  %v1379_v2 = vpop.eup %1378  ;;  %v724_v28 = vsub.f32 1.0, %v723_v16  ;;  %v1003_v33 = vsel %vm979_vm5, %v877_v35, %v1002_v4  ;;  %v909_v47 = vmul.f32 %v644_v20, %v644_v20 }
  0xe8   : > { %v942_v58 = vrot.slane %v941_v21, 2  ;;  %vm728_vm10 = vweird.f32 %v1377_v12  ;;  %v1775_v29 = vadd.f32 1.0, %v1379_v2  ;;  %v888_v30 = vrot.slane %v887_v7, 1 }
  0xe9   : > { %1380 = vpow2.f32 %v1276_v22  ;;  %v725_v18 = vmul.f32 %v1377_v12, %v724_v28  ;;  %v897_v34 = vadd.f32 %v896_v23, %v644_v20  ;;  %v952_v36 = vrot.slane %v909_v47, 4  ;;  %vm729_vm12 = vmor %vm727_vm8, %vm728_vm10 }
  0xea   : > { %v943_v31 = vadd.f32 %v942_v58, %v941_v21  ;;  %vm1777_vm11 = vcmp.eq.f32.partialorder %v731_v17, 8.507059e+37  ;;  %v734_v40 = vor.u32 1.1754944e-38, %v733_v25  ;;  %v933_v42 = vadd.f32 %v932_v15, %v931_v6 }
  0xeb   : > { %1382 = vrcp.f32 %v1775_v29  ;;  %v726_v44 = vadd.f32 %v1377_v12, %v725_v18  ;;  %v889_v45 = vadd.f32 %v888_v30, %v887_v7  ;;  %v898_v53 = vrot.slane %v897_v34, 2 }
  0xec   : > { %v944_v43 = vrot.slane %v943_v31, 1  ;;  %v1022_v24 = vsel %vm979_vm5, %v933_v42, %v1021_v51  ;;  %v1004_v38 = vsel %vm981_vm6, %v1670_v13, %v1003_v33  ;;  %v953_v32 = vadd.f32 %v952_v36, %v909_v47 }
  0xed   : > { %vm985_vm13 = vcmask 1046534   ;;  %v730_v56 = vsel %vm729_vm12, %v1377_v12, %v726_v44  ;;  %v1005_v55 = vsel %vm983_vm7, %v889_v45, %v1004_v38  ;;  %v899_v61 = vadd.f32 %v898_v53, %v897_v34 }
  0xee   : > { %v945_v57 = vadd.f32 %v944_v43, %v943_v31  ;;  %v802_v48 = vmul.f32 %v1662_v27, %v1726_v54  ;;  %v780_v39 = vsel %vm1767_vm9, %v1685_v49, %v775_v3  ;;  %v735_v0 = vsel %vm1777_vm11, %v734_v40, %v730_v56 }
  0xef   : > { %v1381_v63 = vpop.eup %1380  ;;  %v954_v1 = vrot.slane %v953_v32, 2  ;;  %v814_v13 = vrot.slane %v1759_v10, 2  ;;  %v801_v26 = vmul.f32 %v1662_v27, %v735_v0  ;;  %v900_v5 = vrot.slane %v899_v61, 1 }
  0xf0   : > { %v1798_v4 = vadd.f32 1.0, %v1381_v63  ;;  %v1023_v8 = vsel %vm981_vm6, %v1682_v46, %v1022_v24  ;;  %vm987_vm14 = vcmask 1047559   ;;  %v1006_v49 = vsel %vm985_vm13, %v1691_v52, %v1005_v55 }
  0xf1   : > { %v1383_v6 = vpop.eup %1382  ;;  %v955_v54 = vadd.f32 %v954_v1, %v953_v32  ;;  %v824_v3 = vrot.slane %v801_v26, 4  ;;  %v1024_v51 = vsel %vm983_vm7, %v945_v57, %v1023_v8  ;;  %v830_v11 = vrot.slane %v802_v48, 4 }
  0xf2   : > { %v753_v9 = vmul.f32 %v1383_v6, %v1775_v29  ;;  %1384 = vrcp.f32 %v1798_v4  ;;  %v804_v12 = vmul.f32 %v1662_v27, %v780_v39  ;;  %v901_v35 = vadd.f32 %v900_v5, %v899_v61 }
  0xf3   : > { %v815_v14 = vadd.f32 %v814_v13, %v1759_v10  ;;  %v761_v20 = vand.u32 2147483647, %v1775_v29  ;;  %v956_v62 = vrot.slane %v955_v54, 1  ;;  %v825_v16 = vadd.f32 %v824_v3, %v801_v26 }
  0xf4   : > { %v754_v46 = vsub.f32 1.0, %v753_v9  ;;  %v763_v52 = vand.u32 2147483648, %v1775_v29  ;;  %v1007_v17 = vsel %vm987_vm14, %v901_v35, %v1006_v49  ;;  %v1025_v25 = vsel %vm985_vm13, %v1729_v50, %v1024_v51 }
  0xf5   : > { %vm758_vm15 = vweird.f32 %v1383_v6  ;;  %v957_v10 = vadd.f32 %v956_v62, %v955_v54  ;;  %v831_v15 = vadd.f32 %v830_v11, %v802_v48  ;;  %v842_v7 = vrot.slane %v804_v12, 4  ;;  %1010 = vst [vmem:[%s526_s28] sm:$0xff] %v1007_v17 }
  0xf6   : > { %v755_v21 = vmul.f32 %v1383_v6, %v754_v46  ;;  %v809_v22 = vadd.f32 %v808_v60, %v1717_v19  ;;  %v816_v2 = vrot.slane %v815_v14, 1  ;;  %vm757_vm0 = vweird.f32 %v1775_v29 }
  0xf7   : > { %v1026_v50 = vsel %vm987_vm14, %v957_v10, %v1025_v25  ;;  %v826_v33 = vrot.slane %v825_v16, 2  ;;  %vm759_vm2 = vmor %vm757_vm0, %vm758_vm15  ;;  %v764_v58 = vor.u32 1.1754944e-38, %v763_v52  ;;  %v821_v19 = vadd.f32 %v820_v59, %v1721_v41 }
  0xf8   : > { %v1385_v23 = vpop.eup %1384  ;;  %v756_v28 = vadd.f32 %v1383_v6, %v755_v21  ;;  %vm762_vm4 = vcmp.eq.f32.partialorder %v761_v20, 8.507059e+37  ;;  %v832_v30 = vrot.slane %v831_v15, 2  ;;  %v810_v29 = vrot.slane %v809_v22, 1  ;;  %1029 = vst [vmem:[%s533_s14] sm:$0xff] %v1026_v50 }
  0xf9   : > { %v783_v47 = vmul.f32 %v1385_v23, %v1798_v4  ;;  %v843_v34 = vadd.f32 %v842_v7, %v804_v12  ;;  %v817_v36 = vadd.f32 %v816_v2, %v815_v14  ;;  %v793_v40 = vand.u32 2147483648, %v1798_v4 }
  0xfa   : > { %v760_v60 = vsel %vm759_vm2, %v1383_v6, %v756_v28  ;;  %v827_v42 = vadd.f32 %v826_v33, %v825_v16  ;;  %vm788_vm8 = vweird.f32 %v1385_v23  ;;  %v791_v45 = vand.u32 2147483647, %v1798_v4  ;;  %v962_v16 = vld [vmem:[%s512_s18] sm:$0xff] }
  0xfb   : > { %v765_v18 = vsel %vm762_vm4, %v764_v58, %v760_v60  ;;  %v784_v31 = vsub.f32 1.0, %v783_v47  ;;  %v822_v43 = vrot.slane %v821_v19, 1  ;;  %v811_v59 = vadd.f32 %v810_v29, %v809_v22 }
  0xfc   : > { %v803_v37 = vmul.f32 %v1662_v27, %v765_v18  ;;  %vm787_vm9 = vweird.f32 %v1798_v4  ;;  %v844_v24 = vrot.slane %v843_v34, 2  ;;  %v833_v38 = vadd.f32 %v832_v30, %v831_v15 }
  0xfd   : > { %v785_v44 = vmul.f32 %v1385_v23, %v784_v31  ;;  %vm789_vm10 = vmor %vm787_vm9, %vm788_vm8  ;;  %v794_v56 = vor.u32 1.1754944e-38, %v793_v40  ;;  %v976_v57 = vsel %vm975_vm1, %v817_v36, %v811_v59  ;;  %v828_v55 = vrot.slane %v827_v42, 1 }
  0xfe   : > { %v836_v41 = vrot.slane %v803_v37, 4  ;;  %vm792_vm11 = vcmp.eq.f32.partialorder %v791_v45, 8.507059e+37  ;;  %v823_v63 = vadd.f32 %v822_v43, %v821_v19  ;;  %v834_v13 = vrot.slane %v833_v38, 1 }
  0xff   : > { %v786_v53 = vadd.f32 %v1385_v23, %v785_v44  ;;  %v845_v4 = vadd.f32 %v844_v24, %v843_v34  ;;  %v829_v5 = vadd.f32 %v828_v55, %v827_v42 }
 0x100   : > { %v837_v32 = vadd.f32 %v836_v41, %v803_v37  ;;  %v978_v1 = vsel %vm977_vm3, %v823_v63, %v976_v57  ;;  %v835_v3 = vadd.f32 %v834_v13, %v833_v38 }
 0x101   : > { %v790_v61 = vsel %vm789_vm10, %v1385_v23, %v786_v53  ;;  %v980_v54 = vsel %vm979_vm5, %v829_v5, %v978_v1  ;;  %v846_v51 = vrot.slane %v845_v4, 1 }
 0x102   : > { %v838_v48 = vrot.slane %v837_v32, 2  ;;  %v795_v39 = vsel %vm792_vm11, %v794_v56, %v790_v61  ;;  %v982_v12 = vsel %vm981_vm6, %v835_v3, %v980_v54 }
 0x103   : > { %v805_v0 = vmul.f32 %v1662_v27, %v795_v39  ;;  %v847_v14 = vadd.f32 %v846_v51, %v845_v4 }
 0x104   : > { %v839_v26 = vadd.f32 %v838_v48, %v837_v32 }
 0x105   : > { %v848_v6 = vrot.slane %v805_v0, 4 }
 0x106   : > { %v840_v8 = vrot.slane %v839_v26, 1 }
 0x107   : > { %v849_v49 = vadd.f32 %v848_v6, %v805_v0 }
 0x108   : > { %v841_v9 = vadd.f32 %v840_v8, %v839_v26 }
 0x109   : > { %v850_v11 = vrot.slane %v849_v49, 2 }
 0x10a   : > { %v984_v27 = vsel %vm983_vm7, %v841_v9, %v982_v12 }
 0x10b   : > { %v851_v35 = vadd.f32 %v850_v11, %v849_v49  ;;  %v986_v20 = vsel %vm985_vm13, %v847_v14, %v984_v27 }
 0x10d   : > { %v852_v46 = vrot.slane %v851_v35, 1 }
 0x10f   : > { %v853_v62 = vadd.f32 %v852_v46, %v851_v35 }
 0x111   : > { %v988_v52 = vsel %vm987_vm14, %v853_v62, %v986_v20 }
 0x112   : > { %v990_v17 = vadd.f32 %v988_v52, %v962_v16 }
 0x114   : > { %991 = vst [vmem:[%s519_s21] sm:$0xff] %v990_v17 }
 0x115 PF: > { %s20_s11 = sadd.s32 1, %s1408_s11   ;;  %s1888_s30 = smov %s1404_s10 }
 0x116   : > { %p17_p5 = scmp.ge.s32.totalorder %s20_s11, 4   ;;  %s1889_s10 = smov %s1891_s12 }
 0x118   :  { %19 = sbr.rel (!%p17_p5) target bundleno = 2 (0x2), region = 118 }

</bundles_post_ra>
